<compile_context>
chip_gen: v5e
topology: v5e:2x2
jax: 0.10.0
libtpu: 0.0.40
codegen_flags: <defaults>
</compile_context>

<pallas_src>
import math
import jax
import jax.numpy as jnp
from jax.experimental import pallas as pl
from jax.experimental.pallas import tpu as pltpu

# ----------------------------- config (small) -------------------------------
BATCH = 2
SEQ = 8            # config.pad_size
HIDDEN = 32        # config.hidden_size
NUM_HEADS = 4
HEAD_DIM = HIDDEN // NUM_HEADS
INTERMEDIATE = 64  # FFN intermediate size
NUM_LAYERS = 2     # encoder layers owned by this pipeline stage
NUM_CLASSES = 8    # config.num_classes
LN_EPS = 1e-12

LANES = 128        # slab lane width (lane-dense single DMA)

# ---- parameter-slab row layout (all params start at lane 0) -----------------
# per layer (168 rows):
#   rows [  0: 32)  w_qkv   [H, 3H]  (Q columns pre-scaled by 1/sqrt(HEAD_DIM))
#   rows [ 32: 64)  w_out   [H, H]   (rows head-major: row = head*HEAD_DIM + d)
#   rows [ 64: 96)  w_ffn1  [H, I]
#   rows [ 96:160)  w_ffn2  [I, H]
#   rows [160:168)  vectors: 0 b_qkv[3H] 1 b_out[H] 2 ln1_g 3 ln1_b
#                            4 b_ffn1[I] 5 b_ffn2[H] 6 ln2_g 7 ln2_b
LAYER_ROWS = 168
HEAD_BASE = NUM_LAYERS * LAYER_ROWS
# head block (72 rows):
#   rows [ 0:32) w_pool [H, H]; rows [32:64) w_cls [H, C];
#   rows [64:72) vectors: 0 b_pool[H] 1 b_cls[C]
TOTAL_ROWS = HEAD_BASE + 72          # 408 rows -> [408, 128] f32 ~ 204 KB


def _layernorm(h, gamma, beta):
    mean = jnp.mean(h, axis=-1, keepdims=True)
    var = jnp.mean((h - mean) ** 2, axis=-1, keepdims=True)
    return (h - mean) * jax.lax.rsqrt(var + LN_EPS) * gamma + beta


def _gelu(x):
    # BERT-style GELU (tanh approximation)
    return 0.5 * x * (1.0 + jnp.tanh(0.7978845608028654 * (x + 0.044715 * x * x * x)))


# ------------------------------- kernel -------------------------------------
def stage1_kernel(x_ref, p_ref, out_ref):
    B, S, H = x_ref.shape
    BS = B * S
    I = INTERMEDIATE
    HD = HEAD_DIM
    h = x_ref[...].astype(jnp.float32).reshape(BS, H)            # [B*S, H]

    for l in range(NUM_LAYERS):                                  # static unroll
        base = l * LAYER_ROWS
        w_qkv = p_ref[base:base + H, 0:3 * H]                  # [H, 3H]
        w_out = p_ref[base + 32:base + 64, 0:H]                # [H, H]
        w_ffn1 = p_ref[base + 64:base + 96, 0:I]                # [H, I]
        w_ffn2 = p_ref[base + 96:base + 160, 0:H]               # [I, H]
        vr = base + 160
        vec = p_ref[vr:vr + 8, 0:3 * H]                          # aligned [8, 96]
        b_qkv = vec[0:1, 0:3 * H]
        b_out = vec[1:2, 0:H]
        ln1_g = vec[2:3, 0:H]
        ln1_b = vec[3:4, 0:H]
        b_ffn1 = vec[4:5, 0:I]
        b_ffn2 = vec[5:6, 0:H]
        ln2_g = vec[6:7, 0:H]
        ln2_b = vec[7:8, 0:H]

        # ---- fused QKV projection (scale already folded into Q columns) -----
        qkv = jnp.dot(h, w_qkv, preferred_element_type=jnp.float32) + b_qkv
        q3 = qkv[:, 0 * H:1 * H].reshape(B, S, H)
        k3 = qkv[:, 1 * H:2 * H].reshape(B, S, H)
        v3 = qkv[:, 2 * H:3 * H].reshape(B, S, H)

        # ---- multi-head self-attention (mask is all-ones -> no masking) -----
        ctx_heads = []
        for hh in range(NUM_HEADS):
            sl = slice(hh * HD, (hh + 1) * HD)
            qh, kh, vh = q3[:, :, sl], k3[:, :, sl], v3[:, :, sl]   # [B, S, HD]
            s = jnp.einsum('bsd,btd->bst', qh, kh,
                           preferred_element_type=jnp.float32)      # [B, S, S]
            s = s - jnp.max(s, axis=-1, keepdims=True)
            p = jnp.exp(s)
            p = p / jnp.sum(p, axis=-1, keepdims=True)               # exact softmax
            ctx = jnp.einsum('bst,btd->bsd', p, vh,
                             preferred_element_type=jnp.float32)     # [B, S, HD]
            ctx_heads.append(ctx.reshape(BS, HD))
        # single fused output projection instead of 4 accumulating dots
        ctx_cat = jnp.concatenate(ctx_heads, axis=-1)                # [BS, H]
        attn = jnp.dot(ctx_cat, w_out, preferred_element_type=jnp.float32)

        h = _layernorm(h + attn + b_out, ln1_g, ln1_b)

        # ------------------------------ FFN ----------------------------------
        inter = _gelu(jnp.dot(h, w_ffn1, preferred_element_type=jnp.float32) + b_ffn1)
        ffn = jnp.dot(inter, w_ffn2, preferred_element_type=jnp.float32) + b_ffn2
        h = _layernorm(h + ffn, ln2_g, ln2_b)

    # ---- BERT pooler: first token of every sequence -> Linear -> tanh -------
    hb = HEAD_BASE
    w_pool = p_ref[hb:hb + H, 0:H]
    w_cls = p_ref[hb + 32:hb + 64, 0:NUM_CLASSES]
    hvec = p_ref[hb + 64:hb + 72, 0:H]                           # aligned [8, H]
    b_pool = hvec[0:1, 0:H]
    b_cls = hvec[1:2, 0:NUM_CLASSES]

    first = h.reshape(B, S, H)[:, 0:1, :].reshape(B, H)          # [B, H]
    pooled = jnp.tanh(
        jnp.dot(first, w_pool, preferred_element_type=jnp.float32) + b_pool)
    # ---- classification head (self.fc) --------------------------------------
    logits = jnp.dot(pooled, w_cls, preferred_element_type=jnp.float32) + b_cls
    out_ref[...] = logits.astype(out_ref.dtype)                  # single [B, C] store


# ------------------------------ wrapper --------------------------------------
def stage_model1_forward(x, param_slab):
    """x: [B, S, H] float32 hidden states.  Returns logits [B, num_classes]."""
    B = x.shape[0]
    # Single invocation, no grid: activations + all weights are ~280 KB,
    # far below VMEM on v5e/v6e/v7x. Explicit VMEM specs + a small vmem limit
    # document/guarantee the whole-problem-in-VMEM design (2 input DMAs total).
    # TODO(synk): if B*S grows to a few hundred rows, add a row-tile grid with
    #             dimension_semantics=("parallel",) to engage v7x's second TC.
    return pl.pallas_call(
        stage1_kernel,
        out_shape=jax.ShapeDtypeStruct((B, NUM_CLASSES), jnp.float32),
        in_specs=[pl.BlockSpec(memory_space=pltpu.MemorySpace.VMEM),
                  pl.BlockSpec(memory_space=pltpu.MemorySpace.VMEM)],
        out_specs=pl.BlockSpec(memory_space=pltpu.MemorySpace.VMEM),
        compiler_params=pltpu.CompilerParams(vmem_limit_bytes=4 * 1024 * 1024),
    )(x, param_slab)


# --------------------------- deterministic init -------------------------------
def init_params(key):
    """Build the single lane-dense [TOTAL_ROWS, 128] parameter slab.

    Weights stored as [in, out] so the kernel computes x @ W (equivalent to
    PyTorch nn.Linear's x @ W.T). All biases are zero, LN gammas are one.
    The 1/sqrt(HEAD_DIM) attention scale is folded into the Q columns of
    W_qkv (and would go into the Q bias too, which is zero here).
    """
    H, I, C = HIDDEN, INTERMEDIATE, NUM_CLASSES
    std = 0.02
    keys = jax.random.split(key, NUM_LAYERS * 4 + 2)

    def nrm(k, shape):
        return (std * jax.random.normal(k, shape)).astype(jnp.float32)

    slab = jnp.zeros((TOTAL_ROWS, LANES), jnp.float32)
    ki = 0
    q_scale = 1.0 / math.sqrt(HEAD_DIM)
    for l in range(NUM_LAYERS):
        base = l * LAYER_ROWS
        w_qkv = nrm(keys[ki], (H, 3 * H)); ki += 1
        w_qkv = w_qkv.at[:, 0:H].multiply(q_scale)       # fold attention scale
        w_out = nrm(keys[ki], (H, H)); ki += 1            # head-major rows
        w_ffn1 = nrm(keys[ki], (H, I)); ki += 1
        w_ffn2 = nrm(keys[ki], (I, H)); ki += 1
        slab = slab.at[base:base + H, 0:3 * H].set(w_qkv)
        slab = slab.at[base + 32:base + 64, 0:H].set(w_out)
        slab = slab.at[base + 64:base + 96, 0:I].set(w_ffn1)
        slab = slab.at[base + 96:base + 160, 0:H].set(w_ffn2)
        vr = base + 160
        # biases stay zero (slab already zero); LayerNorm gammas -> 1
        slab = slab.at[vr + 2, 0:H].set(jnp.ones((H,), jnp.float32))  # ln1_g
        slab = slab.at[vr + 6, 0:H].set(jnp.ones((H,), jnp.float32))  # ln2_g

    hb = HEAD_BASE
    w_pool = nrm(keys[ki], (H, H)); ki += 1               # pooler
    w_cls = nrm(keys[ki], (H, C)); ki += 1                # self.fc
    slab = slab.at[hb:hb + H, 0:H].set(w_pool)
    slab = slab.at[hb + 32:hb + 64, 0:C].set(w_cls)
    # b_pool / b_cls stay zero
    return slab


if __name__ == "__main__":
    key = jax.random.PRNGKey(0)
    pkey, xkey = jax.random.split(key)
    param_slab = init_params(pkey)
    # x is the encoder_input handed over from the previous pipeline stage.
    x = jax.random.normal(xkey, (BATCH, SEQ, HIDDEN), dtype=jnp.float32)

    out = stage_model1_forward(x, param_slab)
    out = jax.block_until_ready(out)

    assert out.shape == (BATCH, NUM_CLASSES), out.shape
    assert bool(jnp.all(jnp.isfinite(out)))
    print("KERNEL_OK")
</pallas_src>

<mosaic_0001>
module attributes {stable_mosaic.version = 11 : i64} {
  func.func @stage1_kernel(%arg0: memref<2x8x32xf32, #tpu.memory_space<vmem>>, %arg1: memref<408x128xf32, #tpu.memory_space<vmem>>, %arg2: memref<2x8xf32, #tpu.memory_space<vmem>>) attributes {dimension_semantics = [], scalar_prefetch = 0 : i64, scratch_operands = 0 : i64, tpu.core_type = #tpu.core_type<tc>} {
    %c0 = arith.constant 0 : index
    %c0_0 = arith.constant 0 : index
    %c0_1 = arith.constant 0 : index
    %0 = vector.load %arg0[%c0, %c0_0, %c0_1] : memref<2x8x32xf32, #tpu.memory_space<vmem>>, vector<2x8x32xf32>
    %1 = vector.shape_cast %0 : vector<2x8x32xf32> to vector<16x32xf32>
    %c0_2 = arith.constant 0 : index
    %c0_3 = arith.constant 0 : index
    %2 = vector.load %arg1[%c0_2, %c0_3] : memref<408x128xf32, #tpu.memory_space<vmem>>, vector<32x96xf32>
    %c32 = arith.constant 32 : index
    %c0_4 = arith.constant 0 : index
    %3 = vector.load %arg1[%c32, %c0_4] : memref<408x128xf32, #tpu.memory_space<vmem>>, vector<32x32xf32>
    %c64 = arith.constant 64 : index
    %c0_5 = arith.constant 0 : index
    %4 = vector.load %arg1[%c64, %c0_5] : memref<408x128xf32, #tpu.memory_space<vmem>>, vector<32x64xf32>
    %c96 = arith.constant 96 : index
    %c0_6 = arith.constant 0 : index
    %5 = vector.load %arg1[%c96, %c0_6] : memref<408x128xf32, #tpu.memory_space<vmem>>, vector<64x32xf32>
    %c160 = arith.constant 160 : index
    %c0_7 = arith.constant 0 : index
    %6 = vector.load %arg1[%c160, %c0_7] : memref<408x128xf32, #tpu.memory_space<vmem>>, vector<8x96xf32>
    %7 = vector.extract_strided_slice %6 {offsets = [0, 0], sizes = [1, 96], strides = [1, 1]} : vector<8x96xf32> to vector<1x96xf32>
    %8 = vector.extract_strided_slice %6 {offsets = [1, 0], sizes = [1, 32], strides = [1, 1]} : vector<8x96xf32> to vector<1x32xf32>
    %9 = vector.extract_strided_slice %6 {offsets = [2, 0], sizes = [1, 32], strides = [1, 1]} : vector<8x96xf32> to vector<1x32xf32>
    %10 = vector.extract_strided_slice %6 {offsets = [3, 0], sizes = [1, 32], strides = [1, 1]} : vector<8x96xf32> to vector<1x32xf32>
    %11 = vector.extract_strided_slice %6 {offsets = [4, 0], sizes = [1, 64], strides = [1, 1]} : vector<8x96xf32> to vector<1x64xf32>
    %12 = vector.extract_strided_slice %6 {offsets = [5, 0], sizes = [1, 32], strides = [1, 1]} : vector<8x96xf32> to vector<1x32xf32>
    %13 = vector.extract_strided_slice %6 {offsets = [6, 0], sizes = [1, 32], strides = [1, 1]} : vector<8x96xf32> to vector<1x32xf32>
    %14 = vector.extract_strided_slice %6 {offsets = [7, 0], sizes = [1, 32], strides = [1, 1]} : vector<8x96xf32> to vector<1x32xf32>
    %cst = arith.constant dense<0.000000e+00> : vector<16x96xf32>
    %15 = tpu.matmul %1, %2, %cst {dimension_numbers = #tpu.dot_dimension_numbers<[1], [0], [0], [1], [0, 0, 1, 1], [], []>} : vector<16x32xf32>, vector<32x96xf32>, vector<16x96xf32> -> vector<16x96xf32>
    %16 = vector.broadcast %7 : vector<1x96xf32> to vector<16x96xf32>
    %17 = arith.addf %15, %16 : vector<16x96xf32>
    %18 = vector.extract_strided_slice %17 {offsets = [0, 0], sizes = [16, 32], strides = [1, 1]} : vector<16x96xf32> to vector<16x32xf32>
    %19 = vector.shape_cast %18 : vector<16x32xf32> to vector<2x8x32xf32>
    %20 = vector.extract_strided_slice %17 {offsets = [0, 32], sizes = [16, 32], strides = [1, 1]} : vector<16x96xf32> to vector<16x32xf32>
    %21 = vector.shape_cast %20 : vector<16x32xf32> to vector<2x8x32xf32>
    %22 = vector.extract_strided_slice %17 {offsets = [0, 64], sizes = [16, 32], strides = [1, 1]} : vector<16x96xf32> to vector<16x32xf32>
    %23 = vector.shape_cast %22 : vector<16x32xf32> to vector<2x8x32xf32>
    %24 = vector.extract_strided_slice %19 {offsets = [0, 0, 0], sizes = [2, 8, 8], strides = [1, 1, 1]} : vector<2x8x32xf32> to vector<2x8x8xf32>
    %25 = vector.extract_strided_slice %21 {offsets = [0, 0, 0], sizes = [2, 8, 8], strides = [1, 1, 1]} : vector<2x8x32xf32> to vector<2x8x8xf32>
    %26 = vector.extract_strided_slice %23 {offsets = [0, 0, 0], sizes = [2, 8, 8], strides = [1, 1, 1]} : vector<2x8x32xf32> to vector<2x8x8xf32>
    "tpu.trace_start"() <{level = 10 : i32, message = "bsd,btd->bst"}> : () -> ()
    %cst_8 = arith.constant dense<0.000000e+00> : vector<2x8x8xf32>
    %27 = tpu.matmul %24, %25, %cst_8 {dimension_numbers = #tpu.dot_dimension_numbers<[2], [2], [1], [1], [0, 0, 0, 1, 1, 1], [0], [0]>} : vector<2x8x8xf32>, vector<2x8x8xf32>, vector<2x8x8xf32> -> vector<2x8x8xf32>
    "tpu.trace_stop"() : () -> ()
    %cst_9 = arith.constant dense<0xFF800000> : vector<2x8xf32>
    %28 = vector.multi_reduction <maximumf>, %27, %cst_9 [2] : vector<2x8x8xf32> to vector<2x8xf32>
    %29 = vector.shape_cast %28 : vector<2x8xf32> to vector<2x8x1xf32>
    %30 = vector.broadcast %29 : vector<2x8x1xf32> to vector<2x8x8xf32>
    %31 = arith.subf %27, %30 : vector<2x8x8xf32>
    %32 = math.exp %31 : vector<2x8x8xf32>
    %cst_10 = arith.constant dense<0.000000e+00> : vector<2x8xf32>
    %33 = vector.multi_reduction <add>, %32, %cst_10 [2] : vector<2x8x8xf32> to vector<2x8xf32>
    %34 = vector.shape_cast %33 : vector<2x8xf32> to vector<2x8x1xf32>
    %35 = vector.broadcast %34 : vector<2x8x1xf32> to vector<2x8x8xf32>
    %36 = arith.divf %32, %35 : vector<2x8x8xf32>
    "tpu.trace_start"() <{level = 10 : i32, message = "bst,btd->bsd"}> : () -> ()
    %cst_11 = arith.constant dense<0.000000e+00> : vector<2x8x8xf32>
    %37 = tpu.matmul %36, %26, %cst_11 {dimension_numbers = #tpu.dot_dimension_numbers<[2], [1], [1], [2], [0, 0, 0, 1, 1, 2], [0], [0]>} : vector<2x8x8xf32>, vector<2x8x8xf32>, vector<2x8x8xf32> -> vector<2x8x8xf32>
    "tpu.trace_stop"() : () -> ()
    %38 = vector.shape_cast %37 : vector<2x8x8xf32> to vector<16x8xf32>
    %39 = vector.extract_strided_slice %19 {offsets = [0, 0, 8], sizes = [2, 8, 8], strides = [1, 1, 1]} : vector<2x8x32xf32> to vector<2x8x8xf32>
    %40 = vector.extract_strided_slice %21 {offsets = [0, 0, 8], sizes = [2, 8, 8], strides = [1, 1, 1]} : vector<2x8x32xf32> to vector<2x8x8xf32>
    %41 = vector.extract_strided_slice %23 {offsets = [0, 0, 8], sizes = [2, 8, 8], strides = [1, 1, 1]} : vector<2x8x32xf32> to vector<2x8x8xf32>
    "tpu.trace_start"() <{level = 10 : i32, message = "bsd,btd->bst"}> : () -> ()
    %cst_12 = arith.constant dense<0.000000e+00> : vector<2x8x8xf32>
    %42 = tpu.matmul %39, %40, %cst_12 {dimension_numbers = #tpu.dot_dimension_numbers<[2], [2], [1], [1], [0, 0, 0, 1, 1, 1], [0], [0]>} : vector<2x8x8xf32>, vector<2x8x8xf32>, vector<2x8x8xf32> -> vector<2x8x8xf32>
    "tpu.trace_stop"() : () -> ()
    %cst_13 = arith.constant dense<0xFF800000> : vector<2x8xf32>
    %43 = vector.multi_reduction <maximumf>, %42, %cst_13 [2] : vector<2x8x8xf32> to vector<2x8xf32>
    %44 = vector.shape_cast %43 : vector<2x8xf32> to vector<2x8x1xf32>
    %45 = vector.broadcast %44 : vector<2x8x1xf32> to vector<2x8x8xf32>
    %46 = arith.subf %42, %45 : vector<2x8x8xf32>
    %47 = math.exp %46 : vector<2x8x8xf32>
    %cst_14 = arith.constant dense<0.000000e+00> : vector<2x8xf32>
    %48 = vector.multi_reduction <add>, %47, %cst_14 [2] : vector<2x8x8xf32> to vector<2x8xf32>
    %49 = vector.shape_cast %48 : vector<2x8xf32> to vector<2x8x1xf32>
    %50 = vector.broadcast %49 : vector<2x8x1xf32> to vector<2x8x8xf32>
    %51 = arith.divf %47, %50 : vector<2x8x8xf32>
    "tpu.trace_start"() <{level = 10 : i32, message = "bst,btd->bsd"}> : () -> ()
    %cst_15 = arith.constant dense<0.000000e+00> : vector<2x8x8xf32>
    %52 = tpu.matmul %51, %41, %cst_15 {dimension_numbers = #tpu.dot_dimension_numbers<[2], [1], [1], [2], [0, 0, 0, 1, 1, 2], [0], [0]>} : vector<2x8x8xf32>, vector<2x8x8xf32>, vector<2x8x8xf32> -> vector<2x8x8xf32>
    "tpu.trace_stop"() : () -> ()
    %53 = vector.shape_cast %52 : vector<2x8x8xf32> to vector<16x8xf32>
    %54 = vector.extract_strided_slice %19 {offsets = [0, 0, 16], sizes = [2, 8, 8], strides = [1, 1, 1]} : vector<2x8x32xf32> to vector<2x8x8xf32>
    %55 = vector.extract_strided_slice %21 {offsets = [0, 0, 16], sizes = [2, 8, 8], strides = [1, 1, 1]} : vector<2x8x32xf32> to vector<2x8x8xf32>
    %56 = vector.extract_strided_slice %23 {offsets = [0, 0, 16], sizes = [2, 8, 8], strides = [1, 1, 1]} : vector<2x8x32xf32> to vector<2x8x8xf32>
    "tpu.trace_start"() <{level = 10 : i32, message = "bsd,btd->bst"}> : () -> ()
    %cst_16 = arith.constant dense<0.000000e+00> : vector<2x8x8xf32>
    %57 = tpu.matmul %54, %55, %cst_16 {dimension_numbers = #tpu.dot_dimension_numbers<[2], [2], [1], [1], [0, 0, 0, 1, 1, 1], [0], [0]>} : vector<2x8x8xf32>, vector<2x8x8xf32>, vector<2x8x8xf32> -> vector<2x8x8xf32>
    "tpu.trace_stop"() : () -> ()
    %cst_17 = arith.constant dense<0xFF800000> : vector<2x8xf32>
    %58 = vector.multi_reduction <maximumf>, %57, %cst_17 [2] : vector<2x8x8xf32> to vector<2x8xf32>
    %59 = vector.shape_cast %58 : vector<2x8xf32> to vector<2x8x1xf32>
    %60 = vector.broadcast %59 : vector<2x8x1xf32> to vector<2x8x8xf32>
    %61 = arith.subf %57, %60 : vector<2x8x8xf32>
    %62 = math.exp %61 : vector<2x8x8xf32>
    %cst_18 = arith.constant dense<0.000000e+00> : vector<2x8xf32>
    %63 = vector.multi_reduction <add>, %62, %cst_18 [2] : vector<2x8x8xf32> to vector<2x8xf32>
    %64 = vector.shape_cast %63 : vector<2x8xf32> to vector<2x8x1xf32>
    %65 = vector.broadcast %64 : vector<2x8x1xf32> to vector<2x8x8xf32>
    %66 = arith.divf %62, %65 : vector<2x8x8xf32>
    "tpu.trace_start"() <{level = 10 : i32, message = "bst,btd->bsd"}> : () -> ()
    %cst_19 = arith.constant dense<0.000000e+00> : vector<2x8x8xf32>
    %67 = tpu.matmul %66, %56, %cst_19 {dimension_numbers = #tpu.dot_dimension_numbers<[2], [1], [1], [2], [0, 0, 0, 1, 1, 2], [0], [0]>} : vector<2x8x8xf32>, vector<2x8x8xf32>, vector<2x8x8xf32> -> vector<2x8x8xf32>
    "tpu.trace_stop"() : () -> ()
    %68 = vector.shape_cast %67 : vector<2x8x8xf32> to vector<16x8xf32>
    %69 = vector.extract_strided_slice %19 {offsets = [0, 0, 24], sizes = [2, 8, 8], strides = [1, 1, 1]} : vector<2x8x32xf32> to vector<2x8x8xf32>
    %70 = vector.extract_strided_slice %21 {offsets = [0, 0, 24], sizes = [2, 8, 8], strides = [1, 1, 1]} : vector<2x8x32xf32> to vector<2x8x8xf32>
    %71 = vector.extract_strided_slice %23 {offsets = [0, 0, 24], sizes = [2, 8, 8], strides = [1, 1, 1]} : vector<2x8x32xf32> to vector<2x8x8xf32>
    "tpu.trace_start"() <{level = 10 : i32, message = "bsd,btd->bst"}> : () -> ()
    %cst_20 = arith.constant dense<0.000000e+00> : vector<2x8x8xf32>
    %72 = tpu.matmul %69, %70, %cst_20 {dimension_numbers = #tpu.dot_dimension_numbers<[2], [2], [1], [1], [0, 0, 0, 1, 1, 1], [0], [0]>} : vector<2x8x8xf32>, vector<2x8x8xf32>, vector<2x8x8xf32> -> vector<2x8x8xf32>
    "tpu.trace_stop"() : () -> ()
    %cst_21 = arith.constant dense<0xFF800000> : vector<2x8xf32>
    %73 = vector.multi_reduction <maximumf>, %72, %cst_21 [2] : vector<2x8x8xf32> to vector<2x8xf32>
    %74 = vector.shape_cast %73 : vector<2x8xf32> to vector<2x8x1xf32>
    %75 = vector.broadcast %74 : vector<2x8x1xf32> to vector<2x8x8xf32>
    %76 = arith.subf %72, %75 : vector<2x8x8xf32>
    %77 = math.exp %76 : vector<2x8x8xf32>
    %cst_22 = arith.constant dense<0.000000e+00> : vector<2x8xf32>
    %78 = vector.multi_reduction <add>, %77, %cst_22 [2] : vector<2x8x8xf32> to vector<2x8xf32>
    %79 = vector.shape_cast %78 : vector<2x8xf32> to vector<2x8x1xf32>
    %80 = vector.broadcast %79 : vector<2x8x1xf32> to vector<2x8x8xf32>
    %81 = arith.divf %77, %80 : vector<2x8x8xf32>
    "tpu.trace_start"() <{level = 10 : i32, message = "bst,btd->bsd"}> : () -> ()
    %cst_23 = arith.constant dense<0.000000e+00> : vector<2x8x8xf32>
    %82 = tpu.matmul %81, %71, %cst_23 {dimension_numbers = #tpu.dot_dimension_numbers<[2], [1], [1], [2], [0, 0, 0, 1, 1, 2], [0], [0]>} : vector<2x8x8xf32>, vector<2x8x8xf32>, vector<2x8x8xf32> -> vector<2x8x8xf32>
    "tpu.trace_stop"() : () -> ()
    %83 = vector.shape_cast %82 : vector<2x8x8xf32> to vector<16x8xf32>
    %84 = tpu.concatenate %38, %53, %68, %83 in 1 : vector<16x8xf32>, vector<16x8xf32>, vector<16x8xf32>, vector<16x8xf32> -> vector<16x32xf32>
    %cst_24 = arith.constant dense<0.000000e+00> : vector<16x32xf32>
    %85 = tpu.matmul %84, %3, %cst_24 {dimension_numbers = #tpu.dot_dimension_numbers<[1], [0], [0], [1], [0, 0, 1, 1], [], []>} : vector<16x32xf32>, vector<32x32xf32>, vector<16x32xf32> -> vector<16x32xf32>
    %86 = arith.addf %1, %85 : vector<16x32xf32>
    %87 = vector.broadcast %8 : vector<1x32xf32> to vector<16x32xf32>
    %88 = arith.addf %86, %87 : vector<16x32xf32>
    %cst_25 = arith.constant dense<0.000000e+00> : vector<16xf32>
    %89 = vector.multi_reduction <add>, %88, %cst_25 [1] : vector<16x32xf32> to vector<16xf32>
    %90 = vector.shape_cast %89 : vector<16xf32> to vector<16x1xf32>
    %cst_26 = arith.constant 3.200000e+01 : f32
    %91 = vector.broadcast %cst_26 : f32 to vector<16x1xf32>
    %92 = arith.divf %90, %91 : vector<16x1xf32>
    %93 = vector.broadcast %92 : vector<16x1xf32> to vector<16x32xf32>
    %94 = arith.subf %88, %93 : vector<16x32xf32>
    %95 = arith.mulf %94, %94 : vector<16x32xf32>
    %cst_27 = arith.constant dense<0.000000e+00> : vector<16xf32>
    %96 = vector.multi_reduction <add>, %95, %cst_27 [1] : vector<16x32xf32> to vector<16xf32>
    %97 = vector.shape_cast %96 : vector<16xf32> to vector<16x1xf32>
    %cst_28 = arith.constant 3.200000e+01 : f32
    %98 = vector.broadcast %cst_28 : f32 to vector<16x1xf32>
    %99 = arith.divf %97, %98 : vector<16x1xf32>
    %100 = vector.broadcast %92 : vector<16x1xf32> to vector<16x32xf32>
    %101 = arith.subf %88, %100 : vector<16x32xf32>
    %cst_29 = arith.constant 9.99999996E-13 : f32
    %102 = vector.broadcast %cst_29 : f32 to vector<16x1xf32>
    %103 = arith.addf %99, %102 : vector<16x1xf32>
    %104 = math.rsqrt %103 : vector<16x1xf32>
    %105 = vector.broadcast %104 : vector<16x1xf32> to vector<16x32xf32>
    %106 = arith.mulf %101, %105 : vector<16x32xf32>
    %107 = vector.broadcast %9 : vector<1x32xf32> to vector<16x32xf32>
    %108 = arith.mulf %106, %107 : vector<16x32xf32>
    %109 = vector.broadcast %10 : vector<1x32xf32> to vector<16x32xf32>
    %110 = arith.addf %108, %109 : vector<16x32xf32>
    %cst_30 = arith.constant dense<0.000000e+00> : vector<16x64xf32>
    %111 = tpu.matmul %110, %4, %cst_30 {dimension_numbers = #tpu.dot_dimension_numbers<[1], [0], [0], [1], [0, 0, 1, 1], [], []>} : vector<16x32xf32>, vector<32x64xf32>, vector<16x64xf32> -> vector<16x64xf32>
    %112 = vector.broadcast %11 : vector<1x64xf32> to vector<16x64xf32>
    %113 = arith.addf %111, %112 : vector<16x64xf32>
    %cst_31 = arith.constant 5.000000e-01 : f32
    %114 = vector.broadcast %cst_31 : f32 to vector<16x64xf32>
    %115 = arith.mulf %114, %113 : vector<16x64xf32>
    %cst_32 = arith.constant 4.471500e-02 : f32
    %116 = vector.broadcast %cst_32 : f32 to vector<16x64xf32>
    %117 = arith.mulf %116, %113 : vector<16x64xf32>
    %118 = arith.mulf %117, %113 : vector<16x64xf32>
    %119 = arith.mulf %118, %113 : vector<16x64xf32>
    %120 = arith.addf %113, %119 : vector<16x64xf32>
    %cst_33 = arith.constant 0.797884583 : f32
    %121 = vector.broadcast %cst_33 : f32 to vector<16x64xf32>
    %122 = arith.mulf %121, %120 : vector<16x64xf32>
    %123 = math.tanh %122 : vector<16x64xf32>
    %cst_34 = arith.constant 1.000000e+00 : f32
    %124 = vector.broadcast %cst_34 : f32 to vector<16x64xf32>
    %125 = arith.addf %124, %123 : vector<16x64xf32>
    %126 = arith.mulf %115, %125 : vector<16x64xf32>
    %cst_35 = arith.constant dense<0.000000e+00> : vector<16x32xf32>
    %127 = tpu.matmul %126, %5, %cst_35 {dimension_numbers = #tpu.dot_dimension_numbers<[1], [0], [0], [1], [0, 0, 1, 1], [], []>} : vector<16x64xf32>, vector<64x32xf32>, vector<16x32xf32> -> vector<16x32xf32>
    %128 = vector.broadcast %12 : vector<1x32xf32> to vector<16x32xf32>
    %129 = arith.addf %127, %128 : vector<16x32xf32>
    %130 = arith.addf %110, %129 : vector<16x32xf32>
    %cst_36 = arith.constant dense<0.000000e+00> : vector<16xf32>
    %131 = vector.multi_reduction <add>, %130, %cst_36 [1] : vector<16x32xf32> to vector<16xf32>
    %132 = vector.shape_cast %131 : vector<16xf32> to vector<16x1xf32>
    %cst_37 = arith.constant 3.200000e+01 : f32
    %133 = vector.broadcast %cst_37 : f32 to vector<16x1xf32>
    %134 = arith.divf %132, %133 : vector<16x1xf32>
    %135 = vector.broadcast %134 : vector<16x1xf32> to vector<16x32xf32>
    %136 = arith.subf %130, %135 : vector<16x32xf32>
    %137 = arith.mulf %136, %136 : vector<16x32xf32>
    %cst_38 = arith.constant dense<0.000000e+00> : vector<16xf32>
    %138 = vector.multi_reduction <add>, %137, %cst_38 [1] : vector<16x32xf32> to vector<16xf32>
    %139 = vector.shape_cast %138 : vector<16xf32> to vector<16x1xf32>
    %cst_39 = arith.constant 3.200000e+01 : f32
    %140 = vector.broadcast %cst_39 : f32 to vector<16x1xf32>
    %141 = arith.divf %139, %140 : vector<16x1xf32>
    %142 = vector.broadcast %134 : vector<16x1xf32> to vector<16x32xf32>
    %143 = arith.subf %130, %142 : vector<16x32xf32>
    %cst_40 = arith.constant 9.99999996E-13 : f32
    %144 = vector.broadcast %cst_40 : f32 to vector<16x1xf32>
    %145 = arith.addf %141, %144 : vector<16x1xf32>
    %146 = math.rsqrt %145 : vector<16x1xf32>
    %147 = vector.broadcast %146 : vector<16x1xf32> to vector<16x32xf32>
    %148 = arith.mulf %143, %147 : vector<16x32xf32>
    %149 = vector.broadcast %13 : vector<1x32xf32> to vector<16x32xf32>
    %150 = arith.mulf %148, %149 : vector<16x32xf32>
    %151 = vector.broadcast %14 : vector<1x32xf32> to vector<16x32xf32>
    %152 = arith.addf %150, %151 : vector<16x32xf32>
    %c168 = arith.constant 168 : index
    %c0_41 = arith.constant 0 : index
    %153 = vector.load %arg1[%c168, %c0_41] : memref<408x128xf32, #tpu.memory_space<vmem>>, vector<32x96xf32>
    %c200 = arith.constant 200 : index
    %c0_42 = arith.constant 0 : index
    %154 = vector.load %arg1[%c200, %c0_42] : memref<408x128xf32, #tpu.memory_space<vmem>>, vector<32x32xf32>
    %c232 = arith.constant 232 : index
    %c0_43 = arith.constant 0 : index
    %155 = vector.load %arg1[%c232, %c0_43] : memref<408x128xf32, #tpu.memory_space<vmem>>, vector<32x64xf32>
    %c264 = arith.constant 264 : index
    %c0_44 = arith.constant 0 : index
    %156 = vector.load %arg1[%c264, %c0_44] : memref<408x128xf32, #tpu.memory_space<vmem>>, vector<64x32xf32>
    %c328 = arith.constant 328 : index
    %c0_45 = arith.constant 0 : index
    %157 = vector.load %arg1[%c328, %c0_45] : memref<408x128xf32, #tpu.memory_space<vmem>>, vector<8x96xf32>
    %158 = vector.extract_strided_slice %157 {offsets = [0, 0], sizes = [1, 96], strides = [1, 1]} : vector<8x96xf32> to vector<1x96xf32>
    %159 = vector.extract_strided_slice %157 {offsets = [1, 0], sizes = [1, 32], strides = [1, 1]} : vector<8x96xf32> to vector<1x32xf32>
    %160 = vector.extract_strided_slice %157 {offsets = [2, 0], sizes = [1, 32], strides = [1, 1]} : vector<8x96xf32> to vector<1x32xf32>
    %161 = vector.extract_strided_slice %157 {offsets = [3, 0], sizes = [1, 32], strides = [1, 1]} : vector<8x96xf32> to vector<1x32xf32>
    %162 = vector.extract_strided_slice %157 {offsets = [4, 0], sizes = [1, 64], strides = [1, 1]} : vector<8x96xf32> to vector<1x64xf32>
    %163 = vector.extract_strided_slice %157 {offsets = [5, 0], sizes = [1, 32], strides = [1, 1]} : vector<8x96xf32> to vector<1x32xf32>
    %164 = vector.extract_strided_slice %157 {offsets = [6, 0], sizes = [1, 32], strides = [1, 1]} : vector<8x96xf32> to vector<1x32xf32>
    %165 = vector.extract_strided_slice %157 {offsets = [7, 0], sizes = [1, 32], strides = [1, 1]} : vector<8x96xf32> to vector<1x32xf32>
    %cst_46 = arith.constant dense<0.000000e+00> : vector<16x96xf32>
    %166 = tpu.matmul %152, %153, %cst_46 {dimension_numbers = #tpu.dot_dimension_numbers<[1], [0], [0], [1], [0, 0, 1, 1], [], []>} : vector<16x32xf32>, vector<32x96xf32>, vector<16x96xf32> -> vector<16x96xf32>
    %167 = vector.broadcast %158 : vector<1x96xf32> to vector<16x96xf32>
    %168 = arith.addf %166, %167 : vector<16x96xf32>
    %169 = vector.extract_strided_slice %168 {offsets = [0, 0], sizes = [16, 32], strides = [1, 1]} : vector<16x96xf32> to vector<16x32xf32>
    %170 = vector.shape_cast %169 : vector<16x32xf32> to vector<2x8x32xf32>
    %171 = vector.extract_strided_slice %168 {offsets = [0, 32], sizes = [16, 32], strides = [1, 1]} : vector<16x96xf32> to vector<16x32xf32>
    %172 = vector.shape_cast %171 : vector<16x32xf32> to vector<2x8x32xf32>
    %173 = vector.extract_strided_slice %168 {offsets = [0, 64], sizes = [16, 32], strides = [1, 1]} : vector<16x96xf32> to vector<16x32xf32>
    %174 = vector.shape_cast %173 : vector<16x32xf32> to vector<2x8x32xf32>
    %175 = vector.extract_strided_slice %170 {offsets = [0, 0, 0], sizes = [2, 8, 8], strides = [1, 1, 1]} : vector<2x8x32xf32> to vector<2x8x8xf32>
    %176 = vector.extract_strided_slice %172 {offsets = [0, 0, 0], sizes = [2, 8, 8], strides = [1, 1, 1]} : vector<2x8x32xf32> to vector<2x8x8xf32>
    %177 = vector.extract_strided_slice %174 {offsets = [0, 0, 0], sizes = [2, 8, 8], strides = [1, 1, 1]} : vector<2x8x32xf32> to vector<2x8x8xf32>
    "tpu.trace_start"() <{level = 10 : i32, message = "bsd,btd->bst"}> : () -> ()
    %cst_47 = arith.constant dense<0.000000e+00> : vector<2x8x8xf32>
    %178 = tpu.matmul %175, %176, %cst_47 {dimension_numbers = #tpu.dot_dimension_numbers<[2], [2], [1], [1], [0, 0, 0, 1, 1, 1], [0], [0]>} : vector<2x8x8xf32>, vector<2x8x8xf32>, vector<2x8x8xf32> -> vector<2x8x8xf32>
    "tpu.trace_stop"() : () -> ()
    %cst_48 = arith.constant dense<0xFF800000> : vector<2x8xf32>
    %179 = vector.multi_reduction <maximumf>, %178, %cst_48 [2] : vector<2x8x8xf32> to vector<2x8xf32>
    %180 = vector.shape_cast %179 : vector<2x8xf32> to vector<2x8x1xf32>
    %181 = vector.broadcast %180 : vector<2x8x1xf32> to vector<2x8x8xf32>
    %182 = arith.subf %178, %181 : vector<2x8x8xf32>
    %183 = math.exp %182 : vector<2x8x8xf32>
    %cst_49 = arith.constant dense<0.000000e+00> : vector<2x8xf32>
    %184 = vector.multi_reduction <add>, %183, %cst_49 [2] : vector<2x8x8xf32> to vector<2x8xf32>
    %185 = vector.shape_cast %184 : vector<2x8xf32> to vector<2x8x1xf32>
    %186 = vector.broadcast %185 : vector<2x8x1xf32> to vector<2x8x8xf32>
    %187 = arith.divf %183, %186 : vector<2x8x8xf32>
    "tpu.trace_start"() <{level = 10 : i32, message = "bst,btd->bsd"}> : () -> ()
    %cst_50 = arith.constant dense<0.000000e+00> : vector<2x8x8xf32>
    %188 = tpu.matmul %187, %177, %cst_50 {dimension_numbers = #tpu.dot_dimension_numbers<[2], [1], [1], [2], [0, 0, 0, 1, 1, 2], [0], [0]>} : vector<2x8x8xf32>, vector<2x8x8xf32>, vector<2x8x8xf32> -> vector<2x8x8xf32>
    "tpu.trace_stop"() : () -> ()
    %189 = vector.shape_cast %188 : vector<2x8x8xf32> to vector<16x8xf32>
    %190 = vector.extract_strided_slice %170 {offsets = [0, 0, 8], sizes = [2, 8, 8], strides = [1, 1, 1]} : vector<2x8x32xf32> to vector<2x8x8xf32>
    %191 = vector.extract_strided_slice %172 {offsets = [0, 0, 8], sizes = [2, 8, 8], strides = [1, 1, 1]} : vector<2x8x32xf32> to vector<2x8x8xf32>
    %192 = vector.extract_strided_slice %174 {offsets = [0, 0, 8], sizes = [2, 8, 8], strides = [1, 1, 1]} : vector<2x8x32xf32> to vector<2x8x8xf32>
    "tpu.trace_start"() <{level = 10 : i32, message = "bsd,btd->bst"}> : () -> ()
    %cst_51 = arith.constant dense<0.000000e+00> : vector<2x8x8xf32>
    %193 = tpu.matmul %190, %191, %cst_51 {dimension_numbers = #tpu.dot_dimension_numbers<[2], [2], [1], [1], [0, 0, 0, 1, 1, 1], [0], [0]>} : vector<2x8x8xf32>, vector<2x8x8xf32>, vector<2x8x8xf32> -> vector<2x8x8xf32>
    "tpu.trace_stop"() : () -> ()
    %cst_52 = arith.constant dense<0xFF800000> : vector<2x8xf32>
    %194 = vector.multi_reduction <maximumf>, %193, %cst_52 [2] : vector<2x8x8xf32> to vector<2x8xf32>
    %195 = vector.shape_cast %194 : vector<2x8xf32> to vector<2x8x1xf32>
    %196 = vector.broadcast %195 : vector<2x8x1xf32> to vector<2x8x8xf32>
    %197 = arith.subf %193, %196 : vector<2x8x8xf32>
    %198 = math.exp %197 : vector<2x8x8xf32>
    %cst_53 = arith.constant dense<0.000000e+00> : vector<2x8xf32>
    %199 = vector.multi_reduction <add>, %198, %cst_53 [2] : vector<2x8x8xf32> to vector<2x8xf32>
    %200 = vector.shape_cast %199 : vector<2x8xf32> to vector<2x8x1xf32>
    %201 = vector.broadcast %200 : vector<2x8x1xf32> to vector<2x8x8xf32>
    %202 = arith.divf %198, %201 : vector<2x8x8xf32>
    "tpu.trace_start"() <{level = 10 : i32, message = "bst,btd->bsd"}> : () -> ()
    %cst_54 = arith.constant dense<0.000000e+00> : vector<2x8x8xf32>
    %203 = tpu.matmul %202, %192, %cst_54 {dimension_numbers = #tpu.dot_dimension_numbers<[2], [1], [1], [2], [0, 0, 0, 1, 1, 2], [0], [0]>} : vector<2x8x8xf32>, vector<2x8x8xf32>, vector<2x8x8xf32> -> vector<2x8x8xf32>
    "tpu.trace_stop"() : () -> ()
    %204 = vector.shape_cast %203 : vector<2x8x8xf32> to vector<16x8xf32>
    %205 = vector.extract_strided_slice %170 {offsets = [0, 0, 16], sizes = [2, 8, 8], strides = [1, 1, 1]} : vector<2x8x32xf32> to vector<2x8x8xf32>
    %206 = vector.extract_strided_slice %172 {offsets = [0, 0, 16], sizes = [2, 8, 8], strides = [1, 1, 1]} : vector<2x8x32xf32> to vector<2x8x8xf32>
    %207 = vector.extract_strided_slice %174 {offsets = [0, 0, 16], sizes = [2, 8, 8], strides = [1, 1, 1]} : vector<2x8x32xf32> to vector<2x8x8xf32>
    "tpu.trace_start"() <{level = 10 : i32, message = "bsd,btd->bst"}> : () -> ()
    %cst_55 = arith.constant dense<0.000000e+00> : vector<2x8x8xf32>
    %208 = tpu.matmul %205, %206, %cst_55 {dimension_numbers = #tpu.dot_dimension_numbers<[2], [2], [1], [1], [0, 0, 0, 1, 1, 1], [0], [0]>} : vector<2x8x8xf32>, vector<2x8x8xf32>, vector<2x8x8xf32> -> vector<2x8x8xf32>
    "tpu.trace_stop"() : () -> ()
    %cst_56 = arith.constant dense<0xFF800000> : vector<2x8xf32>
    %209 = vector.multi_reduction <maximumf>, %208, %cst_56 [2] : vector<2x8x8xf32> to vector<2x8xf32>
    %210 = vector.shape_cast %209 : vector<2x8xf32> to vector<2x8x1xf32>
    %211 = vector.broadcast %210 : vector<2x8x1xf32> to vector<2x8x8xf32>
    %212 = arith.subf %208, %211 : vector<2x8x8xf32>
    %213 = math.exp %212 : vector<2x8x8xf32>
    %cst_57 = arith.constant dense<0.000000e+00> : vector<2x8xf32>
    %214 = vector.multi_reduction <add>, %213, %cst_57 [2] : vector<2x8x8xf32> to vector<2x8xf32>
    %215 = vector.shape_cast %214 : vector<2x8xf32> to vector<2x8x1xf32>
    %216 = vector.broadcast %215 : vector<2x8x1xf32> to vector<2x8x8xf32>
    %217 = arith.divf %213, %216 : vector<2x8x8xf32>
    "tpu.trace_start"() <{level = 10 : i32, message = "bst,btd->bsd"}> : () -> ()
    %cst_58 = arith.constant dense<0.000000e+00> : vector<2x8x8xf32>
    %218 = tpu.matmul %217, %207, %cst_58 {dimension_numbers = #tpu.dot_dimension_numbers<[2], [1], [1], [2], [0, 0, 0, 1, 1, 2], [0], [0]>} : vector<2x8x8xf32>, vector<2x8x8xf32>, vector<2x8x8xf32> -> vector<2x8x8xf32>
    "tpu.trace_stop"() : () -> ()
    %219 = vector.shape_cast %218 : vector<2x8x8xf32> to vector<16x8xf32>
    %220 = vector.extract_strided_slice %170 {offsets = [0, 0, 24], sizes = [2, 8, 8], strides = [1, 1, 1]} : vector<2x8x32xf32> to vector<2x8x8xf32>
    %221 = vector.extract_strided_slice %172 {offsets = [0, 0, 24], sizes = [2, 8, 8], strides = [1, 1, 1]} : vector<2x8x32xf32> to vector<2x8x8xf32>
    %222 = vector.extract_strided_slice %174 {offsets = [0, 0, 24], sizes = [2, 8, 8], strides = [1, 1, 1]} : vector<2x8x32xf32> to vector<2x8x8xf32>
    "tpu.trace_start"() <{level = 10 : i32, message = "bsd,btd->bst"}> : () -> ()
    %cst_59 = arith.constant dense<0.000000e+00> : vector<2x8x8xf32>
    %223 = tpu.matmul %220, %221, %cst_59 {dimension_numbers = #tpu.dot_dimension_numbers<[2], [2], [1], [1], [0, 0, 0, 1, 1, 1], [0], [0]>} : vector<2x8x8xf32>, vector<2x8x8xf32>, vector<2x8x8xf32> -> vector<2x8x8xf32>
    "tpu.trace_stop"() : () -> ()
    %cst_60 = arith.constant dense<0xFF800000> : vector<2x8xf32>
    %224 = vector.multi_reduction <maximumf>, %223, %cst_60 [2] : vector<2x8x8xf32> to vector<2x8xf32>
    %225 = vector.shape_cast %224 : vector<2x8xf32> to vector<2x8x1xf32>
    %226 = vector.broadcast %225 : vector<2x8x1xf32> to vector<2x8x8xf32>
    %227 = arith.subf %223, %226 : vector<2x8x8xf32>
    %228 = math.exp %227 : vector<2x8x8xf32>
    %cst_61 = arith.constant dense<0.000000e+00> : vector<2x8xf32>
    %229 = vector.multi_reduction <add>, %228, %cst_61 [2] : vector<2x8x8xf32> to vector<2x8xf32>
    %230 = vector.shape_cast %229 : vector<2x8xf32> to vector<2x8x1xf32>
    %231 = vector.broadcast %230 : vector<2x8x1xf32> to vector<2x8x8xf32>
    %232 = arith.divf %228, %231 : vector<2x8x8xf32>
    "tpu.trace_start"() <{level = 10 : i32, message = "bst,btd->bsd"}> : () -> ()
    %cst_62 = arith.constant dense<0.000000e+00> : vector<2x8x8xf32>
    %233 = tpu.matmul %232, %222, %cst_62 {dimension_numbers = #tpu.dot_dimension_numbers<[2], [1], [1], [2], [0, 0, 0, 1, 1, 2], [0], [0]>} : vector<2x8x8xf32>, vector<2x8x8xf32>, vector<2x8x8xf32> -> vector<2x8x8xf32>
    "tpu.trace_stop"() : () -> ()
    %234 = vector.shape_cast %233 : vector<2x8x8xf32> to vector<16x8xf32>
    %235 = tpu.concatenate %189, %204, %219, %234 in 1 : vector<16x8xf32>, vector<16x8xf32>, vector<16x8xf32>, vector<16x8xf32> -> vector<16x32xf32>
    %cst_63 = arith.constant dense<0.000000e+00> : vector<16x32xf32>
    %236 = tpu.matmul %235, %154, %cst_63 {dimension_numbers = #tpu.dot_dimension_numbers<[1], [0], [0], [1], [0, 0, 1, 1], [], []>} : vector<16x32xf32>, vector<32x32xf32>, vector<16x32xf32> -> vector<16x32xf32>
    %237 = arith.addf %152, %236 : vector<16x32xf32>
    %238 = vector.broadcast %159 : vector<1x32xf32> to vector<16x32xf32>
    %239 = arith.addf %237, %238 : vector<16x32xf32>
    %cst_64 = arith.constant dense<0.000000e+00> : vector<16xf32>
    %240 = vector.multi_reduction <add>, %239, %cst_64 [1] : vector<16x32xf32> to vector<16xf32>
    %241 = vector.shape_cast %240 : vector<16xf32> to vector<16x1xf32>
    %cst_65 = arith.constant 3.200000e+01 : f32
    %242 = vector.broadcast %cst_65 : f32 to vector<16x1xf32>
    %243 = arith.divf %241, %242 : vector<16x1xf32>
    %244 = vector.broadcast %243 : vector<16x1xf32> to vector<16x32xf32>
    %245 = arith.subf %239, %244 : vector<16x32xf32>
    %246 = arith.mulf %245, %245 : vector<16x32xf32>
    %cst_66 = arith.constant dense<0.000000e+00> : vector<16xf32>
    %247 = vector.multi_reduction <add>, %246, %cst_66 [1] : vector<16x32xf32> to vector<16xf32>
    %248 = vector.shape_cast %247 : vector<16xf32> to vector<16x1xf32>
    %cst_67 = arith.constant 3.200000e+01 : f32
    %249 = vector.broadcast %cst_67 : f32 to vector<16x1xf32>
    %250 = arith.divf %248, %249 : vector<16x1xf32>
    %251 = vector.broadcast %243 : vector<16x1xf32> to vector<16x32xf32>
    %252 = arith.subf %239, %251 : vector<16x32xf32>
    %cst_68 = arith.constant 9.99999996E-13 : f32
    %253 = vector.broadcast %cst_68 : f32 to vector<16x1xf32>
    %254 = arith.addf %250, %253 : vector<16x1xf32>
    %255 = math.rsqrt %254 : vector<16x1xf32>
    %256 = vector.broadcast %255 : vector<16x1xf32> to vector<16x32xf32>
    %257 = arith.mulf %252, %256 : vector<16x32xf32>
    %258 = vector.broadcast %160 : vector<1x32xf32> to vector<16x32xf32>
    %259 = arith.mulf %257, %258 : vector<16x32xf32>
    %260 = vector.broadcast %161 : vector<1x32xf32> to vector<16x32xf32>
    %261 = arith.addf %259, %260 : vector<16x32xf32>
    %cst_69 = arith.constant dense<0.000000e+00> : vector<16x64xf32>
    %262 = tpu.matmul %261, %155, %cst_69 {dimension_numbers = #tpu.dot_dimension_numbers<[1], [0], [0], [1], [0, 0, 1, 1], [], []>} : vector<16x32xf32>, vector<32x64xf32>, vector<16x64xf32> -> vector<16x64xf32>
    %263 = vector.broadcast %162 : vector<1x64xf32> to vector<16x64xf32>
    %264 = arith.addf %262, %263 : vector<16x64xf32>
    %cst_70 = arith.constant 5.000000e-01 : f32
    %265 = vector.broadcast %cst_70 : f32 to vector<16x64xf32>
    %266 = arith.mulf %265, %264 : vector<16x64xf32>
    %cst_71 = arith.constant 4.471500e-02 : f32
    %267 = vector.broadcast %cst_71 : f32 to vector<16x64xf32>
    %268 = arith.mulf %267, %264 : vector<16x64xf32>
    %269 = arith.mulf %268, %264 : vector<16x64xf32>
    %270 = arith.mulf %269, %264 : vector<16x64xf32>
    %271 = arith.addf %264, %270 : vector<16x64xf32>
    %cst_72 = arith.constant 0.797884583 : f32
    %272 = vector.broadcast %cst_72 : f32 to vector<16x64xf32>
    %273 = arith.mulf %272, %271 : vector<16x64xf32>
    %274 = math.tanh %273 : vector<16x64xf32>
    %cst_73 = arith.constant 1.000000e+00 : f32
    %275 = vector.broadcast %cst_73 : f32 to vector<16x64xf32>
    %276 = arith.addf %275, %274 : vector<16x64xf32>
    %277 = arith.mulf %266, %276 : vector<16x64xf32>
    %cst_74 = arith.constant dense<0.000000e+00> : vector<16x32xf32>
    %278 = tpu.matmul %277, %156, %cst_74 {dimension_numbers = #tpu.dot_dimension_numbers<[1], [0], [0], [1], [0, 0, 1, 1], [], []>} : vector<16x64xf32>, vector<64x32xf32>, vector<16x32xf32> -> vector<16x32xf32>
    %279 = vector.broadcast %163 : vector<1x32xf32> to vector<16x32xf32>
    %280 = arith.addf %278, %279 : vector<16x32xf32>
    %281 = arith.addf %261, %280 : vector<16x32xf32>
    %cst_75 = arith.constant dense<0.000000e+00> : vector<16xf32>
    %282 = vector.multi_reduction <add>, %281, %cst_75 [1] : vector<16x32xf32> to vector<16xf32>
    %283 = vector.shape_cast %282 : vector<16xf32> to vector<16x1xf32>
    %cst_76 = arith.constant 3.200000e+01 : f32
    %284 = vector.broadcast %cst_76 : f32 to vector<16x1xf32>
    %285 = arith.divf %283, %284 : vector<16x1xf32>
    %286 = vector.broadcast %285 : vector<16x1xf32> to vector<16x32xf32>
    %287 = arith.subf %281, %286 : vector<16x32xf32>
    %288 = arith.mulf %287, %287 : vector<16x32xf32>
    %cst_77 = arith.constant dense<0.000000e+00> : vector<16xf32>
    %289 = vector.multi_reduction <add>, %288, %cst_77 [1] : vector<16x32xf32> to vector<16xf32>
    %290 = vector.shape_cast %289 : vector<16xf32> to vector<16x1xf32>
    %cst_78 = arith.constant 3.200000e+01 : f32
    %291 = vector.broadcast %cst_78 : f32 to vector<16x1xf32>
    %292 = arith.divf %290, %291 : vector<16x1xf32>
    %293 = vector.broadcast %285 : vector<16x1xf32> to vector<16x32xf32>
    %294 = arith.subf %281, %293 : vector<16x32xf32>
    %cst_79 = arith.constant 9.99999996E-13 : f32
    %295 = vector.broadcast %cst_79 : f32 to vector<16x1xf32>
    %296 = arith.addf %292, %295 : vector<16x1xf32>
    %297 = math.rsqrt %296 : vector<16x1xf32>
    %298 = vector.broadcast %297 : vector<16x1xf32> to vector<16x32xf32>
    %299 = arith.mulf %294, %298 : vector<16x32xf32>
    %300 = vector.broadcast %164 : vector<1x32xf32> to vector<16x32xf32>
    %301 = arith.mulf %299, %300 : vector<16x32xf32>
    %302 = vector.broadcast %165 : vector<1x32xf32> to vector<16x32xf32>
    %303 = arith.addf %301, %302 : vector<16x32xf32>
    %c336 = arith.constant 336 : index
    %c0_80 = arith.constant 0 : index
    %304 = vector.load %arg1[%c336, %c0_80] : memref<408x128xf32, #tpu.memory_space<vmem>>, vector<32x32xf32>
    %c368 = arith.constant 368 : index
    %c0_81 = arith.constant 0 : index
    %305 = vector.load %arg1[%c368, %c0_81] : memref<408x128xf32, #tpu.memory_space<vmem>>, vector<32x8xf32>
    %c400 = arith.constant 400 : index
    %c0_82 = arith.constant 0 : index
    %306 = vector.load %arg1[%c400, %c0_82] : memref<408x128xf32, #tpu.memory_space<vmem>>, vector<8x32xf32>
    %307 = vector.extract_strided_slice %306 {offsets = [0, 0], sizes = [1, 32], strides = [1, 1]} : vector<8x32xf32> to vector<1x32xf32>
    %308 = vector.extract_strided_slice %306 {offsets = [1, 0], sizes = [1, 8], strides = [1, 1]} : vector<8x32xf32> to vector<1x8xf32>
    %309 = vector.shape_cast %303 : vector<16x32xf32> to vector<2x8x32xf32>
    %310 = vector.extract_strided_slice %309 {offsets = [0, 0, 0], sizes = [2, 1, 32], strides = [1, 1, 1]} : vector<2x8x32xf32> to vector<2x1x32xf32>
    %311 = vector.shape_cast %310 : vector<2x1x32xf32> to vector<2x32xf32>
    %cst_83 = arith.constant dense<0.000000e+00> : vector<2x32xf32>
    %312 = tpu.matmul %311, %304, %cst_83 {dimension_numbers = #tpu.dot_dimension_numbers<[1], [0], [0], [1], [0, 0, 1, 1], [], []>} : vector<2x32xf32>, vector<32x32xf32>, vector<2x32xf32> -> vector<2x32xf32>
    %313 = vector.broadcast %307 : vector<1x32xf32> to vector<2x32xf32>
    %314 = arith.addf %312, %313 : vector<2x32xf32>
    %315 = math.tanh %314 : vector<2x32xf32>
    %cst_84 = arith.constant dense<0.000000e+00> : vector<2x8xf32>
    %316 = tpu.matmul %315, %305, %cst_84 {dimension_numbers = #tpu.dot_dimension_numbers<[1], [0], [0], [1], [0, 0, 1, 1], [], []>} : vector<2x32xf32>, vector<32x8xf32>, vector<2x8xf32> -> vector<2x8xf32>
    %317 = vector.broadcast %308 : vector<1x8xf32> to vector<2x8xf32>
    %318 = arith.addf %316, %317 : vector<2x8xf32>
    %c0_85 = arith.constant 0 : index
    %c0_86 = arith.constant 0 : index
    %319 = vector.load %arg2[%c0_85, %c0_86] : memref<2x8xf32, #tpu.memory_space<vmem>>, vector<2x8xf32>
    tpu.vector_store %arg2[%c0_85, %c0_86], %318 {strides = array<i32>} : memref<2x8xf32, #tpu.memory_space<vmem>>, vector<2x8xf32>,
    return
  }
}

</mosaic_0001>

<bundles_post_ra>
// kernel: tpu_custom_call.1
= control target key start
LH: loop header
LB: loop body
LE: loop exit
PB: predicated region body
PF: predicated region fallthrough
CT: control target
= control target key end

     0   :  { %7 = vsyncpa [#allocation3], 0  ;;  %s2775_s0 = inlined_call_operand.hbm [shape: f32[2,8,32], index: 0, kind: input, shape index: {}]   ;;  %s2776_s1 = inlined_call_operand.hbm [shape: f32[408,128], index: 1, kind: input, shape index: {}]   ;;  %s2777_s2 = inlined_call_operand.hbm [shape: f32[2,8], index: 2, kind: output, shape index: {}]  }
   0x1   :  { %8 = vsyncpa [#allocation6], 0 }
   0x2   :  { %9 = vsyncpa [#allocation4], 0  ;;  %s14_s11 = sshll.u32 %s2775_s0, 4  ;;  %s2256_s12 = smov [#allocation2]   ;;  %s15_s11 = int_to_ptr.hbm [resolvable:$true] %s14_s11 }
   0x3   :  { %s16_s13 = sshll.u32 %s2256_s12, 4  ;;  %s27_s16 = sshll.u32 %s2776_s1, 4  ;;  %s17_s13 = int_to_ptr.vmem [resolvable:$true] %s16_s13  ;;  %s28_s16 = int_to_ptr.hbm [resolvable:$true] %s27_s16 }
   0x4   :  { %s2257_s17 = smov 128   ;;  %s2258_s18 = smov 8  }
   0x5   :  { %22 = dma.hbm_to_vmem [thread:$0]  %s15_s11, 256, %s17_s13, [#allocation3], %s2257_s17, %s2257_s17, %s2258_s18  }
   0x6   :  { %s2259_s19 = smov [#allocation5]  }
   0x7   :  { %s29_s20 = sshll.u32 %s2259_s19, 4  ;;  %s30_s20 = int_to_ptr.vmem [resolvable:$true] %s29_s20 }
   0x8   :  { %35 = dma.hbm_to_vmem [thread:$0]  %s28_s16, 6528, %s30_s20, [#allocation6], %s2257_s17, %s2257_s17, %s2258_s18  }
   0x9   :  { %2250 = dma.done.wait [#allocation3], 256  }
   0xa   :  { %2251 = vsyncadd [#allocation3], 4294967040 }
   0xb   :  { %2252 = dma.done.wait [#allocation6], 6528  }
   0xc   :  { %2253 = vsyncadd [#allocation6], 4294960768  ;;  %v49_v0 = vld [vmem:[#allocation5 + $0x18] sm:$0xff]  ;;  %v48_v1 = vld [vmem:[#allocation5 + $0x10] sm:$0xff]  ;;  %vm68_vm0 = vcmask 261120   ;;  %s2260_s0 = smov 88  }
   0xd   :  { %87 = vmatpush.msra.mxu0 %v49_v0  ;;  %v47_v2 = vld [vmem:[#allocation5 + $0x8] sm:$0xff]  ;;  %v46_v3 = vld [vmem:[#allocation5] sm:$0xff]  ;;  %v2298_v4 = vld [vmem:[#allocation2] sm:$0xff]  ;;  %s2261_s1 = smov 96   ;;  %s2262_s21 = smov 80   ;;  %vm101_vm1 = vcmask 64512  }
   0xe   :  { %v2302_v5 = vld [vmem:[#allocation2 + $0x8] sm:$0xff]  ;;  %v2306_v6 = vld [vmem:[#allocation5 + $0xa0] sm:$0xff]  ;;  %s2263_s22 = smov 120   ;;  %s2264_s23 = smov 72  }
   0xf   :  { %88 = vmatpush.msra.mxu0 %v48_v1  ;;  %v67_v7 = vperm.slane %v2306_v6, 0  ;;  %s2265_s24 = smov 112   ;;  %s2266_s25 = smov 104  }
  0x10   :  { %s2267_s26 = smov 64   ;;  %s2268_s27 = smov 56  }
  0x11   :  { %89 = vmatpush.msra.mxu0 %v47_v2  ;;  %s2269_s28 = smov 48   ;;  %s2270_s29 = smov 40  }
  0x12   :  { %s2271_s30 = smov 16   ;;  %s2272_s3 = smov 24  }
  0x13   :  { %90 = vmatpush.msra.mxu0 %v46_v3  ;;  %s2274_s4 = smov [#allocation7]   ;;  %s1963_s8 = sshll.u32 %s2777_s2, 4  ;;  %s1964_s8 = int_to_ptr.hbm [resolvable:$true] %s1963_s8 }
  0x14   :  { %1974 = vmatmul.msk.f32.vlgmr.msra.gmra.mxu0 %vm68_vm0, %v2298_v4  ;;  %s1961_s5 = sshll.u32 %s2274_s4, 4  ;;  %s1962_s5 = int_to_ptr.vmem [resolvable:$true] %s1961_s5 }
  0x1c   :  { %1975 = vmatmul.msk.f32.gmra.mxu0 %vm68_vm0, %v2302_v5 }
  0x91   :  { %v92_v8 = vpop.f32.mrf.mxu0 }
  0x92   :  { %v2309_v9 = vadd.f32 %v92_v8, %v67_v7 }
  0x94   :  { %255 = vrot.lane.b32.xlu2 %v2309_v9, %s2260_s0  ;;  %99 = vrot.lane.b32.xlu0 %v2309_v9, %s2261_s1 }
  0x99   :  { %v95_v10 = vpop.f32.mrf.mxu0 }
  0x9a   :  { %v2315_v11 = vadd.f32 %v95_v10, %v67_v7 }
  0x9c   :  { %283 = vrot.lane.b32.xlu1 %v2315_v11, %s2260_s0  ;;  %411 = vrot.lane.b32.xlu2 %v2309_v9, %s2262_s21  ;;  %v2059_v42 = vpack.i.bf16 %v2315_v11, %v2309_v9 }
  0x9d   :  { %127 = vrot.lane.b32.xlu0 %v2315_v11, %s2261_s1 }
  0xa4   :  { %281 = vrot.lane.b32.xlu1 %v2315_v11, %s2263_s22  ;;  %567 = vrot.lane.b32.xlu2 %v2309_v9, %s2264_s23 }
  0xa5   :  { %253 = vrot.lane.b32.xlu0 %v2309_v9, %s2263_s22 }
  0xac   :  { %409 = vrot.lane.b32.xlu1 %v2309_v9, %s2265_s24  ;;  %437 = vrot.lane.b32.xlu2 %v2315_v11, %s2265_s24 }
  0xad   :  { %565 = vrot.lane.b32.xlu0 %v2309_v9, %s2266_s25 }
  0xb4   :  { %439 = vrot.lane.b32.xlu1 %v2315_v11, %s2262_s21 }
  0xb5   :  { %595 = vrot.lane.b32.xlu0 %v2315_v11, %s2264_s23 }
  0xbc   :  { %593 = vrot.lane.b32.xlu1 %v2315_v11, %s2266_s25 }
  0xee   :  { %v256_v12 = vpop.permute.xlu2 %255 }
  0xef   :  { %1982 = vmatpush.xpose.msk.msra.mxu1 %vm101_vm1, %v256_v12 }
  0xf6   :  { %v412_v16 = vpop.permute.xlu2 %411 }
  0xfe   :  { %v568_v19 = vpop.permute.xlu2 %567 }
 0x106   :  { %v100_v13 = vpop.permute.xlu0 %99  ;;  %v438_v24 = vpop.permute.xlu2 %437 }
 0x107   :  { %1976 = vmatpush.xpose.msk.msrb.mxu0 %vm101_vm1, %v100_v13 }
 0x10a   :  { %1977 = vmatmul.msk.f32.vlgmr.msrb.gmra.mxu0 %vm101_vm1, %v2309_v9 }
 0x10e   :  { %v284_v14 = vpop.permute.xlu1 %283 }
 0x10f   :  { %v128_v15 = vpop.permute.xlu0 %127 }
 0x110   :  { %1978 = vmatpush.xpose.msk.msra.mxu2 %vm101_vm1, %v128_v15 }
 0x113   :  { %1979 = vmatmul.msk.f32.vlgmr.msra.gmra.mxu2 %vm101_vm1, %v2315_v11 }
 0x114   :  { %1984 = vmatpush.xpose.msk.msrb.mxu2 %vm101_vm1, %v284_v14 }
 0x116   :  { %v282_v17 = vpop.permute.xlu1 %281 }
 0x117   :  { %v254_v18 = vpop.permute.xlu0 %253 }
 0x118   :  { %1988 = vmatpush.xpose.msk.msra.mxu2 %vm101_vm1, %v412_v16  ;;  %1983 = vmatmul.msk.f32.vlgmr.msra.gmra.mxu1 %vm101_vm1, %v254_v18 }
 0x11b   :  { %1985 = vmatmul.msk.f32.vlgmr.msrb.gmra.mxu2 %vm101_vm1, %v282_v17 }
 0x11c   :  { %1994 = vmatpush.xpose.msk.msrb.mxu2 %vm101_vm1, %v568_v19 }
 0x11e   :  { %v410_v20 = vpop.permute.xlu1 %409 }
 0x11f   :  { %v566_v21 = vpop.permute.xlu0 %565 }
 0x123   :  { %1989 = vmatmul.msk.f32.vlgmr.msra.gmra.mxu2 %vm101_vm1, %v410_v20 }
 0x126   :  { %v440_v22 = vpop.permute.xlu1 %439 }
 0x127   :  { %v596_v23 = vpop.permute.xlu0 %595  ;;  %1990 = vmatpush.xpose.msk.msra.mxu0 %vm101_vm1, %v440_v22 }
 0x12a   :  { %1991 = vmatmul.msk.f32.vlgmr.msra.gmra.mxu0 %vm101_vm1, %v438_v24 }
 0x12b   :  { %1996 = vmatpush.xpose.msk.msrb.mxu0 %vm101_vm1, %v596_v23  ;;  %1995 = vmatmul.msk.f32.vlgmr.msrb.gmra.mxu2 %vm101_vm1, %v566_v21 }
 0x12e   :  { %v594_v25 = vpop.permute.xlu1 %593 }
 0x132   :  { %1997 = vmatmul.msk.f32.vlgmr.msrb.gmra.mxu0 %vm101_vm1, %v594_v25 }
 0x187   :  { %v123_v26 = vpop.f32.mrf.mxu0 }
 0x188   :  { %v153_v27 = vsel %vm101_vm1, %v123_v26, -inf }
 0x189   :  { %154 = vmax.xlane.f32.xlu2 %v153_v27 }
 0x195   :  { %v278_v28 = vpop.f32.mrf.mxu1 }
 0x196   :  { %v150_v29 = vpop.f32.mrf.mxu2  ;;  %v309_v30 = vsel %vm101_vm1, %v278_v28, -inf }
 0x197   :  { %310 = vmax.xlane.f32.xlu1 %v309_v30  ;;  %v156_v31 = vsel %vm101_vm1, %v150_v29, -inf }
 0x198   :  { %157 = vmax.xlane.f32.xlu0 %v156_v31 }
 0x19e   :  { %v306_v32 = vpop.f32.mrf.mxu2 }
 0x19f   :  { %v312_v40 = vsel %vm101_vm1, %v306_v32, -inf }
 0x1a6   :  { %v2362_v33 = vpop.f32.mrf.mxu2 }
 0x1a7   :  { %v462_v34 = vpop.f32.mrf.mxu0  ;;  %v465_v41 = vsel %vm101_vm1, %v2362_v33, -inf }
 0x1a8   :  { %v468_v35 = vsel %vm101_vm1, %v462_v34, -inf }
 0x1a9   :  { %469 = vmax.xlane.f32.xlu1 %v468_v35 }
 0x1ae   :  { %v2365_v36 = vpop.f32.mrf.mxu2 }
 0x1af   :  { %v621_v37 = vsel %vm101_vm1, %v2365_v36, -inf  ;;  %v618_v38 = vpop.f32.mrf.mxu0 }
 0x1b0   :  { %622 = vmax.xlane.f32.xlu0 %v621_v37  ;;  %v624_v39 = vsel %vm101_vm1, %v618_v38, -inf }
 0x1b1   :  { %625 = vmax.xlane.f32.xlu2 %v624_v39 }
 0x1b9   :  { %313 = vmax.xlane.f32.xlu2 %v312_v40 }
 0x1c1   :  { %466 = vmax.xlane.f32.xlu2 %v465_v41 }
 0x1c4   :  { %2060 = vrot.lane.b32.xlu0 %v2059_v42, %s2267_s26 }
 0x1d9   :  { %357 = vrot.lane.b32.xlu2 %v2309_v9, %s2268_s27 }
 0x1fc   :  { %v155_v43 = vpop.xlane.xlu2 %154 }
 0x1fd   :  { %v159_v44 = vsub.f32 %v123_v26, %v155_v43 }
 0x1ff   :  { %v161_v45 = vmul.f32 1.442695, %v159_v44 }
 0x201   :  { %2084 = vpow2.f32 %v161_v45 }
 0x207   :  { %v2378_v46 = vpop.eup %2084 }
 0x208   :  { %v165_v47 = vsel %vm101_vm1, %v2378_v46, 0.0 }
 0x209   :  { %166 = vadd.xlane.f32.xlu0 %v165_v47 }
 0x20a   :  { %v311_v48 = vpop.xlane.xlu1 %310 }
 0x20b   :  { %v315_v49 = vsub.f32 %v278_v28, %v311_v48  ;;  %v158_v53 = vpop.xlane.xlu0 %157 }
 0x20c   :  { %v160_v56 = vsub.f32 %v150_v29, %v158_v53 }
 0x20d   :  { %v317_v50 = vmul.f32 1.442695, %v315_v49 }
 0x20e   :  { %v163_v58 = vmul.f32 1.442695, %v160_v56 }
 0x20f   :  { %2086 = vpow2.f32 %v317_v50 }
 0x215   :  { %v2382_v51 = vpop.eup %2086 }
 0x216   :  { %v321_v52 = vsel %vm101_vm1, %v2382_v51, 0.0 }
 0x217   :  { %322 = vadd.xlane.f32.xlu2 %v321_v52 }
 0x21c   :  { %v470_v54 = vpop.xlane.xlu1 %469 }
 0x21d   :  { %v472_v55 = vsub.f32 %v462_v34, %v470_v54  ;;  %513 = vrot.lane.b32.xlu0 %v2309_v9, %s2269_s28 }
 0x21f   :  { %v475_v57 = vmul.f32 1.442695, %v472_v55 }
 0x221   :  { %2088 = vpow2.f32 %v475_v57 }
 0x222   :  { %2090 = vpow2.f32 %v163_v58 }
 0x223   :  { %v623_v3 = vpop.xlane.xlu0 %622 }
 0x224   :  { %v626_v59 = vpop.xlane.xlu2 %625  ;;  %v627_v19 = vsub.f32 %v2365_v36, %v623_v3 }
 0x225   :  { %383 = vrot.lane.b32.xlu0 %v2315_v11, %s2268_s27  ;;  %v628_v61 = vsub.f32 %v618_v38, %v626_v59 }
 0x226   :  { %v629_v22 = vmul.f32 1.442695, %v627_v19 }
 0x227   :  { %v2390_v60 = vpop.eup %2088  ;;  %v631_v63 = vmul.f32 1.442695, %v628_v61 }
 0x228   :  { %v480_v62 = vsel %vm101_vm1, %v2390_v60, 0.0  ;;  %v2394_v1 = vpop.eup %2090 }
 0x229   :  { %481 = vadd.xlane.f32.xlu1 %v480_v62  ;;  %2092 = vpow2.f32 %v631_v63  ;;  %v168_v8 = vsel %vm101_vm1, %v2394_v1, 0.0 }
 0x22c   :  { %v314_v0 = vpop.xlane.xlu2 %313 }
 0x22d   :  { %v316_v2 = vsub.f32 %v306_v32, %v314_v0  ;;  %539 = vrot.lane.b32.xlu0 %v2315_v11, %s2269_s28 }
 0x22f   :  { %v319_v7 = vmul.f32 1.442695, %v316_v2  ;;  %v2401_v13 = vpop.eup %2092 }
 0x230   :  { %v636_v21 = vsel %vm101_vm1, %v2401_v13, 0.0 }
 0x231   :  { %2094 = vpow2.f32 %v319_v7  ;;  %169 = vadd.xlane.f32.xlu1 %v168_v8 }
 0x234   :  { %v467_v10 = vpop.xlane.xlu2 %466 }
 0x235   :  { %v471_v12 = vsub.f32 %v2362_v33, %v467_v10 }
 0x236   :  { %v2061_v14 = vpop.permute.xlu0 %2060 }
 0x237   :  { %v2403_v15 = vpop.eup %2094  ;;  %v473_v16 = vmul.f32 1.442695, %v471_v12  ;;  %v2062_v17 = vunpack.i.l.bf16 %v2061_v14  ;;  %v2063_v18 = vunpack.i.h.bf16 %v2061_v14 }
 0x238   :  { %v324_v20 = vsel %vm101_vm1, %v2403_v15, 0.0 }
 0x239   :  { %2096 = vpow2.f32 %v473_v16  ;;  %222 = vmatpush.msra.mxu3 %v2062_v17  ;;  %325 = vadd.xlane.f32.xlu2 %v324_v20 }
 0x23a   :  { %637 = vadd.xlane.f32.xlu1 %v636_v21  ;;  %2098 = vpow2.f32 %v629_v22 }
 0x23b   :  { %248 = vmatpush.msrb.mxu3 %v2063_v18 }
 0x23f   :  { %v2410_v23 = vpop.eup %2096 }
 0x240   :  { %v477_v24 = vsel %vm101_vm1, %v2410_v23, 0.0  ;;  %v2414_v25 = vpop.eup %2098 }
 0x241   :  { %v633_v26 = vsel %vm101_vm1, %v2414_v25, 0.0 }
 0x242   :  { %478 = vadd.xlane.f32.xlu1 %v477_v24 }
 0x24a   :  { %634 = vadd.xlane.f32.xlu1 %v633_v26 }
 0x251   :  { %695 = vrot.lane.b32.xlu2 %v2315_v11, %s2270_s29 }
 0x263   :  { %669 = vrot.lane.b32.xlu1 %v2309_v9, %s2270_s29  ;;  %v358_v9 = vpop.permute.xlu2 %357 }
 0x27c   :  { %v167_v27 = vpop.xlane.xlu0 %166 }
 0x27d   :  { %2100 = vrcp.f32 %v167_v27  ;;  %v182_v31 = vand.u32 2147483648, %v167_v27  ;;  %v180_v33 = vand.u32 2147483647, %v167_v27  ;;  %vm176_vm3 = vweird.f32 %v167_v27 }
 0x27f   :  { %v183_v35 = vor.u32 1.1754944e-38, %v182_v31  ;;  %vm181_vm5 = vcmp.eq.f32.partialorder %v180_v33, 8.507059e+37 }
 0x283   :  { %v2101_v28 = vpop.eup %2100 }
 0x284   :  { %v172_v29 = vmul.f32 %v2101_v28, %v167_v27  ;;  %vm177_vm2 = vweird.f32 %v2101_v28 }
 0x285   :  { %vm178_vm4 = vmor %vm176_vm3, %vm177_vm2 }
 0x286   :  { %v173_v30 = vsub.f32 1.0, %v172_v29 }
 0x288   :  { %v174_v32 = vmul.f32 %v2101_v28, %v173_v30 }
 0x28a   :  { %v175_v34 = vadd.f32 %v2101_v28, %v174_v32  ;;  %v323_v40 = vpop.xlane.xlu2 %322 }
 0x28b   :  { %2102 = vrcp.f32 %v323_v40  ;;  %vm332_vm11 = vweird.f32 %v323_v40  ;;  %v338_v7 = vand.u32 2147483648, %v323_v40  ;;  %v336_v16 = vand.u32 2147483647, %v323_v40 }
 0x28c   :  { %v179_v36 = vsel %vm178_vm4, %v2101_v28, %v175_v34 }
 0x28d   :  { %v184_v37 = vsel %vm181_vm5, %v183_v35, %v179_v36  ;;  %v339_v26 = vor.u32 1.1754944e-38, %v338_v7  ;;  %vm337_vm14 = vcmp.eq.f32.partialorder %v336_v16, 8.507059e+37 }
 0x28e   :  { %v185_v11 = vmul.f32 %v2378_v46, %v184_v37 }
 0x28f   :  { %v2423_v38 = vpop.permute.xlu0 %513 }
 0x290   :  { %1980 = vmatmul.msk.f32.vlgmr.msra.gmra.mxu3 %vm101_vm1, %v185_v11 }
 0x291   :  { %378 = vmatpush.msra.mxu3 %v358_v9  ;;  %v2103_v43 = vpop.eup %2102 }
 0x292   :  { %v328_v45 = vmul.f32 %v2103_v43, %v323_v40  ;;  %vm333_vm8 = vweird.f32 %v2103_v43 }
 0x293   :  { %vm2440_vm12 = vmor %vm332_vm11, %vm333_vm8 }
 0x294   :  { %v329_v47 = vsub.f32 1.0, %v328_v45 }
 0x296   :  { %v330_v54 = vmul.f32 %v2103_v43, %v329_v47 }
 0x297   :  { %v384_v39 = vpop.permute.xlu0 %383 }
 0x298   :  { %404 = vmatpush.msrb.mxu1 %v384_v39  ;;  %v331_v62 = vadd.f32 %v2103_v43, %v330_v54 }
 0x29a   :  { %v335_v18 = vsel %vm2440_vm12, %v2103_v43, %v331_v62 }
 0x29b   :  { %v340_v29 = vsel %vm337_vm14, %v339_v26, %v335_v18  ;;  %v51_v26 = vld [vmem:[#allocation5 + $0x28] sm:$0xff] }
 0x29c   :  { %v2426_v41 = vpop.xlane.xlu1 %481  ;;  %v341_v39 = vmul.f32 %v2382_v51, %v340_v29 }
 0x29d   :  { %vm503_vm5 = vweird.f32 %v2426_v41  ;;  %v509_v37 = vand.u32 2147483648, %v2426_v41 }
 0x29f   :  { %v540_v42 = vpop.permute.xlu0 %539  ;;  %v510_v51 = vor.u32 1.1754944e-38, %v509_v37 }
 0x2a0   :  { %560 = vmatpush.msra.mxu1 %v540_v42 }
 0x2a4   :  { %v170_v44 = vpop.xlane.xlu1 %169 }
 0x2a5   :  { %2104 = vrcp.f32 %v170_v44  ;;  %v197_v56 = vand.u32 2147483648, %v170_v44  ;;  %v195_v58 = vand.u32 2147483647, %v170_v44  ;;  %vm191_vm7 = vweird.f32 %v170_v44 }
 0x2a6   :  { %2106 = vrcp.f32 %v2426_v41 }
 0x2a7   :  { %v198_v63 = vor.u32 1.1754944e-38, %v197_v56  ;;  %vm196_vm10 = vcmp.eq.f32.partialorder %v195_v58, 8.507059e+37 }
 0x2ab   :  { %v2105_v46 = vpop.eup %2104 }
 0x2ac   :  { %v2429_v48 = vpop.eup %2106  ;;  %v187_v49 = vmul.f32 %v2105_v46, %v170_v44  ;;  %v326_v50 = vpop.xlane.xlu2 %325  ;;  %vm192_vm6 = vweird.f32 %v2105_v46 }
 0x2ad   :  { %2108 = vrcp.f32 %v326_v50  ;;  %v2431_v52 = vpop.xlane.xlu1 %637  ;;  %v499_v55 = vmul.f32 %v2429_v48, %v2426_v41  ;;  %vm193_vm9 = vmor %vm191_vm7, %vm192_vm6  ;;  %v353_v19 = vand.u32 2147483648, %v326_v50  ;;  %v351_v24 = vand.u32 2147483647, %v326_v50 }
 0x2ae   :  { %v188_v53 = vsub.f32 1.0, %v187_v49  ;;  %2110 = vrcp.f32 %v2431_v52  ;;  %vm347_vm15 = vweird.f32 %v326_v50  ;;  %vm504_vm3 = vweird.f32 %v2429_v48 }
 0x2af   :  { %v500_v0 = vsub.f32 1.0, %v499_v55  ;;  %v354_v30 = vor.u32 1.1754944e-38, %v353_v19  ;;  %vm352_vm4 = vcmp.eq.f32.partialorder %v351_v24, 8.507059e+37  ;;  %vm2458_vm6 = vmor %vm503_vm5, %vm504_vm3  ;;  %v665_v55 = vand.u32 2147483648, %v2431_v52  ;;  %v52_v24 = vld [vmem:[#allocation5 + $0x30] sm:$0xff] }
 0x2b0   :  { %v189_v57 = vmul.f32 %v2105_v46, %v188_v53 }
 0x2b1   :  { %v501_v21 = vmul.f32 %v2429_v48, %v500_v0  ;;  %v666_v0 = vor.u32 1.1754944e-38, %v665_v55 }
 0x2b2   :  { %v190_v59 = vadd.f32 %v2105_v46, %v189_v57  ;;  %v663_v57 = vand.u32 2147483647, %v2431_v52 }
 0x2b3   :  { %v2109_v61 = vpop.eup %2108  ;;  %v502_v31 = vadd.f32 %v2429_v48, %v501_v21 }
 0x2b4   :  { %v343_v2 = vmul.f32 %v2109_v61, %v326_v50  ;;  %v194_v3 = vsel %vm193_vm9, %v2105_v46, %v190_v59  ;;  %v2438_v12 = vpop.eup %2110  ;;  %vm348_vm13 = vweird.f32 %v2109_v61  ;;  %v696_v45 = vpop.permute.xlu2 %695 }
 0x2b5   :  { %v2436_v8 = vpop.xlane.xlu1 %478  ;;  %v199_v10 = vsel %vm196_vm10, %v198_v63, %v194_v3  ;;  %v655_v27 = vmul.f32 %v2438_v12, %v2431_v52  ;;  %vm349_vm2 = vmor %vm347_vm15, %vm348_vm13  ;;  %v506_v42 = vsel %vm2458_vm6, %v2429_v48, %v502_v31  ;;  %vm660_vm10 = vweird.f32 %v2438_v12 }
 0x2b6   :  { %v344_v17 = vsub.f32 1.0, %v343_v2  ;;  %2112 = vrcp.f32 %v2436_v8  ;;  %v200_v20 = vmul.f32 %v2394_v1, %v199_v10  ;;  %v494_v43 = vand.u32 2147483648, %v2436_v8 }
 0x2b7   :  { %v656_v33 = vsub.f32 1.0, %v655_v27  ;;  %v492_v47 = vand.u32 2147483647, %v2436_v8  ;;  %vm488_vm9 = vweird.f32 %v2436_v8  ;;  %vm659_vm13 = vweird.f32 %v2431_v52  ;;  %v50_v27 = vld [vmem:[#allocation5 + $0x20] sm:$0xff] }
 0x2b8   :  { %v345_v22 = vmul.f32 %v2109_v61, %v344_v17  ;;  %1981 = vmatmul.msk.f32.vlgmr.msrb.gmra.mxu3 %vm101_vm1, %v200_v20  ;;  %v495_v49 = vor.u32 1.1754944e-38, %v494_v43  ;;  %vm661_vm14 = vmor %vm659_vm13, %vm660_vm10  ;;  %vm664_vm15 = vcmp.eq.f32.partialorder %v663_v57, 8.507059e+37  ;;  %vm747_vm6 = vcmask 130048  }
 0x2b9   :  { %534 = vmatpush.msrb.mxu3 %v2423_v38  ;;  %v507_v38 = vand.u32 2147483647, %v2426_v41  ;;  %v657_v44 = vmul.f32 %v2438_v12, %v656_v33  ;;  %vm493_vm12 = vcmp.eq.f32.partialorder %v492_v47, 8.507059e+37  ;;  %v2273_v47 = vmov 32.0  }
 0x2ba   :  { %v346_v28 = vadd.f32 %v2109_v61, %v345_v22  ;;  %v53_v22 = vld [vmem:[#allocation5 + $0x38] sm:$0xff] }
 0x2bb   :  { %vm508_vm8 = vcmp.eq.f32.partialorder %v507_v38, 8.507059e+37  ;;  %v658_v50 = vadd.f32 %v2438_v12, %v657_v44  ;;  %771 = vmatpush.msra.mxu2 %v53_v22  ;;  %v784_v38 = vperm.slane %v2306_v6, 1 }
 0x2bc   :  { %v2113_v1 = vpop.eup %2112  ;;  %v350_v32 = vsel %vm349_vm2, %v2109_v61, %v346_v28  ;;  %v511_v48 = vsel %vm508_vm8, %v510_v51, %v506_v42 }
 0x2bd   :  { %v484_v34 = vmul.f32 %v2113_v1, %v2436_v8  ;;  %v635_v35 = vpop.xlane.xlu1 %634  ;;  %v355_v36 = vsel %vm352_vm4, %v354_v30, %v350_v32  ;;  %vm489_vm7 = vweird.f32 %v2113_v1  ;;  %v512_v61 = vmul.f32 %v2390_v60, %v511_v48  ;;  %772 = vmatpush.msra.mxu2 %v52_v24 }
 0x2be   :  { %2114 = vrcp.f32 %v635_v35  ;;  %v356_v40 = vmul.f32 %v2403_v15, %v355_v36  ;;  %vm490_vm11 = vmor %vm488_vm9, %vm489_vm7  ;;  %v662_v62 = vsel %vm661_vm14, %v2438_v12, %v658_v50  ;;  %v650_v7 = vand.u32 2147483648, %v635_v35 }
 0x2bf   :  { %v485_v9 = vsub.f32 1.0, %v484_v34  ;;  %v667_v3 = vsel %vm664_vm15, %v666_v0, %v662_v62  ;;  %vm644_vm3 = vweird.f32 %v635_v35  ;;  %v648_v52 = vand.u32 2147483647, %v635_v35  ;;  %773 = vmatpush.msra.mxu2 %v51_v26  ;;  %v57_v62 = vld [vmem:[#allocation5 + $0x58] sm:$0xff]  ;;  %v55_v0 = vld [vmem:[#allocation5 + $0x48] sm:$0xff] }
 0x2c0   :  { %1986 = vmatmul.msk.f32.vlgmr.msra.gmra.mxu3 %vm101_vm1, %v341_v39  ;;  %1987 = vmatmul.msk.f32.vlgmr.msrb.gmra.mxu1 %vm101_vm1, %v356_v40  ;;  %v668_v60 = vmul.f32 %v2401_v13, %v667_v3  ;;  %v651_v8 = vor.u32 1.1754944e-38, %v650_v7  ;;  %vm750_vm7 = vcmask 195584   ;;  %2116 = vrcp.f32 %v2273_v47 }
 0x2c1   :  { %v486_v46 = vmul.f32 %v2113_v1, %v485_v9  ;;  %716 = vmatpush.msrb.mxu1 %v696_v45  ;;  %vm649_vm5 = vcmp.eq.f32.partialorder %v648_v52, 8.507059e+37  ;;  %774 = vmatpush.msra.mxu2 %v50_v27  ;;  %v841_v24 = vperm.slane %v2306_v6, 3  ;;  %vm893_vm15 = vcmask 523264  }
 0x2c2   :  { %863 = vmatpush.msra.mxu0 %v57_v62 }
 0x2c3   :  { %v487_v15 = vadd.f32 %v2113_v1, %v486_v46 }
 0x2c4   :  { %v2115_v41 = vpop.eup %2114 }
 0x2c5   :  { %v491_v53 = vsel %vm490_vm11, %v2113_v1, %v487_v15  ;;  %v640_v54 = vmul.f32 %v2115_v41, %v635_v35  ;;  %vm645_vm2 = vweird.f32 %v2115_v41 }
 0x2c6   :  { %v496_v56 = vsel %vm493_vm12, %v495_v49, %v491_v53  ;;  %vm646_vm4 = vmor %vm644_vm3, %vm645_vm2  ;;  %v2117_v51 = vpop.eup %2116 }
 0x2c7   :  { %v641_v58 = vsub.f32 1.0, %v640_v54  ;;  %v497_v59 = vmul.f32 %v2410_v23, %v496_v56  ;;  %v794_v15 = vmul.f32 32.0, %v2117_v51  ;;  %vm798_vm8 = vweird.f32 %v2117_v51 }
 0x2c8   :  { %1993 = vmatmul.msk.f32.vlgmr.msra.gmra.mxu1 %vm101_vm1, %v512_v61 }
 0x2c9   :  { %v642_v63 = vmul.f32 %v2115_v41, %v641_v58  ;;  %1992 = vmatmul.msk.f32.vlgmr.msrb.gmra.mxu3 %vm101_vm1, %v497_v59 }
 0x2cb   :  { %v643_v2 = vadd.f32 %v2115_v41, %v642_v63  ;;  %v56_v63 = vld [vmem:[#allocation5 + $0x50] sm:$0xff] }
 0x2cc   :  { %864 = vmatpush.msra.mxu0 %v56_v63  ;;  %v892_v63 = vperm.slane %v2306_v6, 5 }
 0x2cd   :  { %v647_v23 = vsel %vm646_vm4, %v2115_v41, %v643_v2  ;;  %v795_v41 = vsub.f32 1.0, %v794_v15  ;;  %v54_v2 = vld [vmem:[#allocation5 + $0x40] sm:$0xff] }
 0x2ce   :  { %v652_v10 = vsel %vm649_vm5, %v651_v8, %v647_v23  ;;  %865 = vmatpush.msra.mxu0 %v55_v0 }
 0x2cf   :  { %v653_v14 = vmul.f32 %v2414_v25, %v652_v10  ;;  %v796_v48 = vmul.f32 %v2117_v51, %v795_v41 }
 0x2d0   :  { %1999 = vmatmul.msk.f32.vlgmr.msrb.gmra.mxu1 %vm101_vm1, %v668_v60  ;;  %866 = vmatpush.msra.mxu0 %v54_v2 }
 0x2d1   :  { %v797_v49 = vadd.f32 %v2117_v51, %v796_v48 }
 0x2d5   :  { %v670_v12 = vpop.permute.xlu1 %669 }
 0x2d6   :  { %690 = vmatpush.msra.mxu3 %v670_v12 }
 0x2d7   :  { %1998 = vmatmul.msk.f32.vlgmr.msra.gmra.mxu3 %vm101_vm1, %v653_v14 }
 0x313   :  { %v224_v16 = vpop.f32.mrf.mxu3 }
 0x33b   :  { %v250_v17 = vpop.f32.mrf.mxu3 }
 0x33d   :  { %v406_v18 = vpop.f32.mrf.mxu1 }
 0x343   :  { %v380_v19 = vpop.f32.mrf.mxu3 }
 0x344   :  { %723 = vrot.lane.b32.xlu0 %v380_v19, %s2258_s18 }
 0x345   :  { %v562_v20 = vpop.f32.mrf.mxu1 }
 0x346   :  { %733 = vrot.lane.b32.xlu1 %v562_v20, %s2271_s30 }
 0x34c   :  { %v536_v13 = vpop.f32.mrf.mxu3 }
 0x34d   :  { %731 = vrot.lane.b32.xlu2 %v536_v13, %s2271_s30  ;;  %v718_v25 = vpop.f32.mrf.mxu1  ;;  %v838_v13 = vperm.slane %v2306_v6, 2 }
 0x355   :  { %725 = vrot.lane.b32.xlu2 %v406_v18, %s2258_s18 }
 0x35a   :  { %v692_v21 = vpop.f32.mrf.mxu3 }
 0x35b   :  { %739 = vrot.lane.b32.xlu0 %v692_v21, %s2272_s3 }
 0x363   :  { %741 = vrot.lane.b32.xlu0 %v718_v25, %s2272_s3 }
 0x3a7   :  { %v732_v29 = vpop.permute.xlu2 %731 }
 0x3af   :  { %v726_v33 = vpop.permute.xlu2 %725 }
 0x3b0   :  { %v746_v35 = vsel %vm101_vm1, %v250_v17, %v726_v33 }
 0x3b6   :  { %v724_v28 = vpop.permute.xlu0 %723 }
 0x3b7   :  { %v745_v30 = vsel %vm101_vm1, %v224_v16, %v724_v28 }
 0x3b8   :  { %v748_v1 = vsel %vm747_vm6, %v745_v30, %v732_v29  ;;  %v734_v34 = vpop.permute.xlu1 %733 }
 0x3b9   :  { %v749_v36 = vsel %vm747_vm6, %v746_v35, %v734_v34  ;;  %v65_v34 = vld [vmem:[#allocation5 + $0x98] sm:$0xff]  ;;  %v64_v35 = vld [vmem:[#allocation5 + $0x90] sm:$0xff] }
 0x3ba   :  { %908 = vmatpush.msrb.mxu3 %v65_v34 }
 0x3bc   :  { %909 = vmatpush.msrb.mxu3 %v64_v35 }
 0x3cd   :  { %v740_v31 = vpop.permute.xlu0 %739 }
 0x3ce   :  { %v751_v32 = vsel %vm750_vm7, %v748_v1, %v740_v31 }
 0x3cf   :  { %2000 = vmatmul.msk.f32.vlgmr.msra.gmra.mxu2 %vm68_vm0, %v751_v32 }
 0x3d5   :  { %v742_v37 = vpop.permute.xlu0 %741 }
 0x3d6   :  { %v752_v11 = vsel %vm750_vm7, %v749_v36, %v742_v37  ;;  %v63_v36 = vld [vmem:[#allocation5 + $0x88] sm:$0xff]  ;;  %v62_v37 = vld [vmem:[#allocation5 + $0x80] sm:$0xff] }
 0x3d7   :  { %2001 = vmatmul.msk.f32.gmra.mxu2 %vm68_vm0, %v752_v11  ;;  %910 = vmatpush.msrb.mxu3 %v63_v36  ;;  %v61_v11 = vld [vmem:[#allocation5 + $0x78] sm:$0xff] }
 0x3d9   :  { %911 = vmatpush.msrb.mxu3 %v62_v37 }
 0x3db   :  { %912 = vmatpush.msrb.mxu3 %v61_v11 }
 0x452   :  { %v776_v9 = vpop.f32.mrf.mxu2 }
 0x453   :  { %v782_v39 = vadd.f32 %v776_v9, %v2298_v4  ;;  %v2507_v4 = vsel %vm798_vm8, %v2117_v51, %v797_v49  ;;  %v59_v9 = vld [vmem:[#allocation5 + $0x68] sm:$0xff] }
 0x455   :  { %v785_v40 = vadd.f32 %v784_v38, %v782_v39  ;;  %v58_v39 = vld [vmem:[#allocation5 + $0x60] sm:$0xff] }
 0x457   :  { %v787_v42 = vsel %vm68_vm0, %v785_v40, 0.0 }
 0x458   :  { %788 = vadd.xlane.f32.xlu2 %v787_v42 }
 0x45a   :  { %v779_v43 = vpop.f32.mrf.mxu2 }
 0x45b   :  { %v783_v44 = vadd.f32 %v779_v43, %v2302_v5 }
 0x45d   :  { %v786_v45 = vadd.f32 %v784_v38, %v783_v44  ;;  %v60_v38 = vld [vmem:[#allocation5 + $0x70] sm:$0xff] }
 0x45e   :  { %913 = vmatpush.msrb.mxu3 %v60_v38  ;;  %v2176_v38 = vld [vmem:[#allocation5 + $0xa0] sm:$0xff] }
 0x45f   :  { %v790_v46 = vsel %vm68_vm0, %v786_v45, 0.0 }
 0x460   :  { %791 = vadd.xlane.f32.xlu1 %v790_v46  ;;  %914 = vmatpush.msrb.mxu3 %v59_v9  ;;  %v969_v9 = vperm.slane %v2176_v38, 6 }
 0x462   :  { %915 = vmatpush.msrb.mxu3 %v58_v39 }
 0x4cb   :  { %v789_v50 = vpop.xlane.xlu2 %788 }
 0x4cc   :  { %v800_v53 = vmul.f32 %v2507_v4, %v789_v50 }
 0x4ce   :  { %v802_v54 = vsub.f32 %v785_v40, %v800_v53  ;;  %v844_v40 = vperm.slane %v2306_v6, 4 }
 0x4d0   :  { %v804_v55 = vmul.f32 %v802_v54, %v802_v54 }
 0x4d2   :  { %v806_v5 = vsel %vm68_vm0, %v804_v55, 0.0 }
 0x4d3   :  { %807 = vadd.xlane.f32.xlu0 %v806_v5  ;;  %v792_v56 = vpop.xlane.xlu1 %791 }
 0x4d4   :  { %v801_v57 = vmul.f32 %v2507_v4, %v792_v56 }
 0x4d6   :  { %v803_v58 = vsub.f32 %v786_v45, %v801_v57 }
 0x4d8   :  { %v805_v59 = vmul.f32 %v803_v58, %v803_v58 }
 0x4da   :  { %v809_v61 = vsel %vm68_vm0, %v805_v59, 0.0 }
 0x4db   :  { %810 = vadd.xlane.f32.xlu2 %v809_v61 }
 0x546   :  { %v808_v3 = vpop.xlane.xlu0 %807 }
 0x547   :  { %v812_v7 = vmul.f32 %v808_v3, %v2507_v4 }
 0x549   :  { %v814_v52 = vadd.f32 1e-12, %v812_v7 }
 0x54b   :  { %2118 = vrsqrt.f32 %v814_v52  ;;  %vm822_vm10 = vweird.f32 %v814_v52 }
 0x54e   :  { %v811_v23 = vpop.xlane.xlu2 %810 }
 0x54f   :  { %v813_v60 = vmul.f32 %v811_v23, %v2507_v4 }
 0x551   :  { %v2119_v8 = vpop.eup %2118  ;;  %v815_v10 = vadd.f32 1e-12, %v813_v60 }
 0x552   :  { %v817_v12 = vmul.f32 %v2119_v8, %v814_v52  ;;  %vm823_vm9 = vweird.f32 %v2119_v8 }
 0x553   :  { %2120 = vrsqrt.f32 %v815_v10  ;;  %vm824_vm11 = vmor %vm822_vm10, %vm823_vm9  ;;  %vm832_vm13 = vweird.f32 %v815_v10 }
 0x554   :  { %v818_v14 = vmul.f32 %v2119_v8, %v817_v12 }
 0x556   :  { %v819_v16 = vmul.f32 0.5, %v818_v14 }
 0x558   :  { %v820_v17 = vsub.f32 1.5, %v819_v16 }
 0x559   :  { %v2121_v18 = vpop.eup %2120 }
 0x55a   :  { %v821_v19 = vmul.f32 %v2119_v8, %v820_v17  ;;  %v827_v20 = vmul.f32 %v2121_v18, %v815_v10  ;;  %vm833_vm12 = vweird.f32 %v2121_v18 }
 0x55b   :  { %vm834_vm14 = vmor %vm832_vm13, %vm833_vm12 }
 0x55c   :  { %v825_v21 = vsel %vm824_vm11, %v2119_v8, %v821_v19  ;;  %v828_v25 = vmul.f32 %v2121_v18, %v827_v20 }
 0x55d   :  { %v836_v22 = vmul.f32 %v825_v21, %v802_v54  ;;  %v978_v21 = vld [vmem:[#allocation5 + $0xc0] sm:$0xff] }
 0x55e   :  { %v829_v26 = vmul.f32 0.5, %v828_v25  ;;  %1015 = vmatpush.msra.mxu1 %v978_v21  ;;  %v977_v25 = vld [vmem:[#allocation5 + $0xb8] sm:$0xff] }
 0x55f   :  { %v839_v27 = vmul.f32 %v838_v13, %v836_v22  ;;  %v976_v22 = vld [vmem:[#allocation5 + $0xb0] sm:$0xff] }
 0x560   :  { %v830_v28 = vsub.f32 1.5, %v829_v26  ;;  %1016 = vmatpush.msra.mxu1 %v977_v25 }
 0x561   :  { %v842_v29 = vadd.f32 %v841_v24, %v839_v27 }
 0x562   :  { %v831_v30 = vmul.f32 %v2121_v18, %v830_v28  ;;  %1017 = vmatpush.msra.mxu1 %v976_v22 }
 0x563   :  { %2002 = vmatmul.msk.f32.vlgmr.msra.gmra.mxu0 %vm68_vm0, %v842_v29 }
 0x564   :  { %v835_v1 = vsel %vm834_vm14, %v2121_v18, %v831_v30 }
 0x565   :  { %v837_v31 = vmul.f32 %v835_v1, %v803_v58 }
 0x567   :  { %v840_v32 = vmul.f32 %v838_v13, %v837_v31 }
 0x569   :  { %v843_v33 = vadd.f32 %v841_v24, %v840_v32  ;;  %v975_v24 = vld [vmem:[#allocation5 + $0xa8] sm:$0xff] }
 0x56a   :  { %1018 = vmatpush.msra.mxu1 %v975_v24 }
 0x56b   :  { %2003 = vmatmul.msk.f32.gmra.mxu0 %vm68_vm0, %v843_v33 }
 0x5e0   :  { %v868_v42 = vpop.f32.mrf.mxu0 }
 0x5e1   :  { %v869_v43 = vadd.f32 %v868_v42, %v844_v40 }
 0x5e3   :  { %v876_v44 = vmul.f32 0.044715, %v869_v43  ;;  %v874_v5 = vmul.f32 0.5, %v869_v43 }
 0x5e5   :  { %v878_v45 = vmul.f32 %v876_v44, %v869_v43 }
 0x5e7   :  { %v880_v46 = vmul.f32 %v878_v45, %v869_v43 }
 0x5e8   :  { %v871_v47 = vpop.f32.mrf.mxu0 }
 0x5e9   :  { %v882_v51 = vadd.f32 %v880_v46, %v869_v43  ;;  %v872_v15 = vadd.f32 %v871_v47, %v844_v40  ;;  %v972_v43 = vperm.slane %v2176_v38, 7 }
 0x5eb   :  { %v884_v41 = vmul.f32 0.7978846, %v882_v51  ;;  %v877_v48 = vmul.f32 0.044715, %v872_v15  ;;  %v875_v59 = vmul.f32 0.5, %v872_v15 }
 0x5ed   :  { %2122 = vtanh.f32 %v884_v41  ;;  %v879_v49 = vmul.f32 %v877_v48, %v872_v15 }
 0x5ef   :  { %v881_v50 = vmul.f32 %v879_v49, %v872_v15 }
 0x5f1   :  { %v883_v53 = vadd.f32 %v881_v50, %v872_v15  ;;  %v2539_v50 = vld [vmem:[#allocation5 + $0x148] sm:$0xff] }
 0x5f3   :  { %v2123_v54 = vpop.eup %2122  ;;  %v885_v55 = vmul.f32 0.7978846, %v883_v53  ;;  %v996_v53 = vperm.slane %v2539_v50, 0 }
 0x5f4   :  { %v888_v56 = vadd.f32 1.0, %v2123_v54 }
 0x5f5   :  { %2124 = vtanh.f32 %v885_v55 }
 0x5f6   :  { %v890_v57 = vmul.f32 %v888_v56, %v874_v5 }
 0x5f8   :  { %2004 = vmatmul.msk.f32.vlgmr.msrb.gmra.mxu3 %vm893_vm15, %v890_v57 }
 0x5fb   :  { %v2125_v58 = vpop.eup %2124 }
 0x5fc   :  { %v889_v61 = vadd.f32 1.0, %v2125_v58 }
 0x5fe   :  { %v891_v62 = vmul.f32 %v889_v61, %v875_v59 }
 0x600   :  { %2005 = vmatmul.msk.f32.gmra.mxu3 %vm893_vm15, %v891_v62 }
 0x67b   :  { %v917_v0 = vpop.f32.mrf.mxu3 }
 0x67c   :  { %v918_v2 = vadd.f32 %v917_v0, %v892_v63 }
 0x67e   :  { %v923_v3 = vadd.f32 %v918_v2, %v842_v29 }
 0x680   :  { %v925_v7 = vsel %vm68_vm0, %v923_v3, 0.0 }
 0x681   :  { %926 = vadd.xlane.f32.xlu1 %v925_v7 }
 0x683   :  { %v920_v52 = vpop.f32.mrf.mxu3 }
 0x684   :  { %v921_v23 = vadd.f32 %v920_v52, %v892_v63 }
 0x686   :  { %v924_v60 = vadd.f32 %v921_v23, %v843_v33 }
 0x688   :  { %v928_v8 = vsel %vm68_vm0, %v924_v60, 0.0 }
 0x689   :  { %929 = vadd.xlane.f32.xlu0 %v928_v8 }
 0x6f4   :  { %v927_v10 = vpop.xlane.xlu1 %926 }
 0x6f5   :  { %v931_v12 = vmul.f32 %v927_v10, %v2507_v4 }
 0x6f7   :  { %v933_v14 = vsub.f32 %v923_v3, %v931_v12 }
 0x6f9   :  { %v935_v16 = vmul.f32 %v933_v14, %v933_v14 }
 0x6fb   :  { %v937_v17 = vsel %vm68_vm0, %v935_v16, 0.0 }
 0x6fc   :  { %v930_v6 = vpop.xlane.xlu0 %929  ;;  %938 = vadd.xlane.f32.xlu2 %v937_v17 }
 0x6fd   :  { %v932_v18 = vmul.f32 %v930_v6, %v2507_v4 }
 0x6ff   :  { %v934_v19 = vsub.f32 %v924_v60, %v932_v18 }
 0x701   :  { %v936_v20 = vmul.f32 %v934_v19, %v934_v19 }
 0x703   :  { %v940_v13 = vsel %vm68_vm0, %v936_v20, 0.0 }
 0x704   :  { %941 = vadd.xlane.f32.xlu1 %v940_v13 }
 0x76f   :  { %v939_v26 = vpop.xlane.xlu2 %938 }
 0x770   :  { %v943_v27 = vmul.f32 %v939_v26, %v2507_v4 }
 0x772   :  { %v945_v28 = vadd.f32 1e-12, %v943_v27 }
 0x774   :  { %2126 = vrsqrt.f32 %v945_v28  ;;  %vm953_vm3 = vweird.f32 %v945_v28 }
 0x777   :  { %v942_v29 = vpop.xlane.xlu1 %941 }
 0x778   :  { %v944_v30 = vmul.f32 %v942_v29, %v2507_v4 }
 0x77a   :  { %v2127_v1 = vpop.eup %2126  ;;  %v946_v31 = vadd.f32 1e-12, %v944_v30 }
 0x77b   :  { %v948_v32 = vmul.f32 %v2127_v1, %v945_v28  ;;  %vm954_vm2 = vweird.f32 %v2127_v1 }
 0x77c   :  { %2128 = vrsqrt.f32 %v946_v31  ;;  %vm955_vm4 = vmor %vm953_vm3, %vm954_vm2  ;;  %vm963_vm8 = vweird.f32 %v946_v31 }
 0x77d   :  { %v949_v33 = vmul.f32 %v2127_v1, %v948_v32 }
 0x77f   :  { %v950_v34 = vmul.f32 0.5, %v949_v33 }
 0x781   :  { %v951_v35 = vsub.f32 1.5, %v950_v34 }
 0x782   :  { %v2129_v36 = vpop.eup %2128 }
 0x783   :  { %v952_v37 = vmul.f32 %v2127_v1, %v951_v35  ;;  %v958_v11 = vmul.f32 %v2129_v36, %v946_v31  ;;  %vm964_vm5 = vweird.f32 %v2129_v36 }
 0x784   :  { %vm965_vm9 = vmor %vm963_vm8, %vm964_vm5 }
 0x785   :  { %v956_v39 = vsel %vm955_vm4, %v2127_v1, %v952_v37  ;;  %v959_v40 = vmul.f32 %v2129_v36, %v958_v11 }
 0x786   :  { %v967_v42 = vmul.f32 %v956_v39, %v933_v14 }
 0x787   :  { %v960_v44 = vmul.f32 0.5, %v959_v40 }
 0x788   :  { %v970_v45 = vmul.f32 %v969_v9, %v967_v42 }
 0x789   :  { %v961_v46 = vsub.f32 1.5, %v960_v44 }
 0x78a   :  { %v2531_v47 = vadd.f32 %v972_v43, %v970_v45 }
 0x78b   :  { %v962_v51 = vmul.f32 %v2129_v36, %v961_v46 }
 0x78c   :  { %2006 = vmatmul.msk.f32.vlgmr.msra.gmra.mxu1 %vm68_vm0, %v2531_v47 }
 0x78d   :  { %v966_v15 = vsel %vm965_vm9, %v2129_v36, %v962_v51 }
 0x78e   :  { %v968_v41 = vmul.f32 %v966_v15, %v934_v19 }
 0x790   :  { %v971_v48 = vmul.f32 %v969_v9, %v968_v41 }
 0x792   :  { %v2535_v49 = vadd.f32 %v972_v43, %v971_v48 }
 0x794   :  { %2007 = vmatmul.msk.f32.gmra.mxu1 %vm68_vm0, %v2535_v49 }
 0x809   :  { %v1020_v54 = vpop.f32.mrf.mxu1 }
 0x80a   :  { %v2542_v55 = vadd.f32 %v1020_v54, %v996_v53 }
 0x80c   :  { %1027 = vrot.lane.b32.xlu0 %v2542_v55, %s2261_s1 }
 0x811   :  { %v1023_v5 = vpop.f32.mrf.mxu1 }
 0x812   :  { %v2546_v56 = vadd.f32 %v1023_v5, %v996_v53 }
 0x814   :  { %1180 = vrot.lane.b32.xlu0 %v2542_v55, %s2263_s22  ;;  %1210 = vrot.lane.b32.xlu1 %v2546_v56, %s2260_s0  ;;  %v2602_v28 = vpack.i.bf16 %v2546_v56, %v2542_v55 }
 0x815   :  { %1054 = vrot.lane.b32.xlu2 %v2546_v56, %s2261_s1 }
 0x81c   :  { %1208 = vrot.lane.b32.xlu0 %v2546_v56, %s2263_s22  ;;  %1366 = vrot.lane.b32.xlu1 %v2546_v56, %s2262_s21 }
 0x81d   :  { %1182 = vrot.lane.b32.xlu2 %v2542_v55, %s2260_s0 }
 0x824   :  { %1338 = vrot.lane.b32.xlu0 %v2542_v55, %s2262_s21  ;;  %1336 = vrot.lane.b32.xlu1 %v2542_v55, %s2265_s24 }
 0x825   :  { %1364 = vrot.lane.b32.xlu2 %v2546_v56, %s2265_s24 }
 0x82c   :  { %1520 = vrot.lane.b32.xlu0 %v2546_v56, %s2266_s25  ;;  %1494 = vrot.lane.b32.xlu1 %v2542_v55, %s2264_s23 }
 0x82d   :  { %1522 = vrot.lane.b32.xlu2 %v2546_v56, %s2264_s23 }
 0x835   :  { %1492 = vrot.lane.b32.xlu2 %v2542_v55, %s2266_s25 }
 0x86f   :  { %v1055_v57 = vpop.permute.xlu2 %1054 }
 0x870   :  { %2010 = vmatpush.xpose.msk.msrb.mxu0 %vm101_vm1, %v1055_v57 }
 0x873   :  { %2011 = vmatmul.msk.f32.vlgmr.msrb.gmra.mxu0 %vm101_vm1, %v2546_v56 }
 0x877   :  { %v1183_v58 = vpop.permute.xlu2 %1182 }
 0x878   :  { %2014 = vmatpush.xpose.msk.msra.mxu0 %vm101_vm1, %v1183_v58 }
 0x87e   :  { %v1028_v59 = vpop.permute.xlu0 %1027 }
 0x87f   :  { %2008 = vmatpush.xpose.msk.msrb.mxu2 %vm101_vm1, %v1028_v59  ;;  %v1365_v61 = vpop.permute.xlu2 %1364 }
 0x882   :  { %2009 = vmatmul.msk.f32.vlgmr.msrb.gmra.mxu2 %vm101_vm1, %v2542_v55 }
 0x886   :  { %v1181_v62 = vpop.permute.xlu0 %1180  ;;  %v1211_v63 = vpop.permute.xlu1 %1210 }
 0x887   :  { %2015 = vmatmul.msk.f32.vlgmr.msra.gmra.mxu0 %vm101_vm1, %v1181_v62  ;;  %2016 = vmatpush.xpose.msk.msra.mxu3 %vm101_vm1, %v1211_v63  ;;  %v1523_v3 = vpop.permute.xlu2 %1522 }
 0x88e   :  { %v1209_v0 = vpop.permute.xlu0 %1208  ;;  %v1367_v2 = vpop.permute.xlu1 %1366 }
 0x88f   :  { %2017 = vmatmul.msk.f32.vlgmr.msra.gmra.mxu3 %vm101_vm1, %v1209_v0  ;;  %v1493_v8 = vpop.permute.xlu2 %1492 }
 0x890   :  { %2022 = vmatpush.xpose.msk.msrb.mxu3 %vm101_vm1, %v1367_v2 }
 0x894   :  { %2028 = vmatpush.xpose.msk.msra.mxu3 %vm101_vm1, %v1523_v3 }
 0x896   :  { %v1339_v7 = vpop.permute.xlu0 %1338  ;;  %v1337_v52 = vpop.permute.xlu1 %1336 }
 0x897   :  { %2020 = vmatpush.xpose.msk.msrb.mxu0 %vm101_vm1, %v1339_v7  ;;  %2023 = vmatmul.msk.f32.vlgmr.msrb.gmra.mxu3 %vm101_vm1, %v1365_v61 }
 0x89a   :  { %2021 = vmatmul.msk.f32.vlgmr.msrb.gmra.mxu0 %vm101_vm1, %v1337_v52 }
 0x89e   :  { %v1521_v23 = vpop.permute.xlu0 %1520  ;;  %v1495_v60 = vpop.permute.xlu1 %1494 }
 0x89f   :  { %2026 = vmatpush.xpose.msk.msra.mxu0 %vm101_vm1, %v1495_v60  ;;  %2029 = vmatmul.msk.f32.vlgmr.msra.gmra.mxu3 %vm101_vm1, %v1521_v23 }
 0x8a2   :  { %2027 = vmatmul.msk.f32.vlgmr.msra.gmra.mxu0 %vm101_vm1, %v1493_v8 }
 0x8f0   :  { %v1077_v10 = vpop.f32.mrf.mxu0 }
 0x8f1   :  { %v1083_v12 = vsel %vm101_vm1, %v1077_v10, -inf }
 0x8f2   :  { %1084 = vmax.xlane.f32.xlu1 %v1083_v12 }
 0x904   :  { %v1205_v14 = vpop.f32.mrf.mxu0 }
 0x905   :  { %v1050_v16 = vpop.f32.mrf.mxu2  ;;  %v1236_v17 = vsel %vm101_vm1, %v1205_v14, -inf }
 0x906   :  { %1237 = vmax.xlane.f32.xlu2 %v1236_v17  ;;  %v1080_v6 = vsel %vm101_vm1, %v1050_v16, -inf }
 0x907   :  { %1081 = vmax.xlane.f32.xlu0 %v1080_v6 }
 0x912   :  { %v1233_v18 = vpop.f32.mrf.mxu3 }
 0x913   :  { %v1239_v19 = vsel %vm101_vm1, %v1233_v18, -inf }
 0x914   :  { %1240 = vmax.xlane.f32.xlu0 %v1239_v19 }
 0x917   :  { %v1361_v20 = vpop.f32.mrf.mxu0 }
 0x918   :  { %v1392_v13 = vsel %vm101_vm1, %v1361_v20, -inf }
 0x919   :  { %1393 = vmax.xlane.f32.xlu1 %v1392_v13 }
 0x91a   :  { %v1389_v21 = vpop.f32.mrf.mxu3 }
 0x91b   :  { %v1395_v25 = vsel %vm101_vm1, %v1389_v21, -inf }
 0x91c   :  { %1396 = vmax.xlane.f32.xlu2 %v1395_v25 }
 0x91f   :  { %v1517_v22 = vpop.f32.mrf.mxu0 }
 0x920   :  { %v1548_v24 = vsel %vm101_vm1, %v1517_v22, -inf }
 0x921   :  { %1549 = vmax.xlane.f32.xlu0 %v1548_v24 }
 0x922   :  { %v1545_v26 = vpop.f32.mrf.mxu3 }
 0x923   :  { %v1551_v27 = vsel %vm101_vm1, %v1545_v26, -inf }
 0x924   :  { %1552 = vmax.xlane.f32.xlu1 %v1551_v27 }
 0x934   :  { %2065 = vrot.lane.b32.xlu2 %v2602_v28, %s2267_s26 }
 0x965   :  { %v1085_v29 = vpop.xlane.xlu1 %1084 }
 0x966   :  { %v1087_v30 = vsub.f32 %v1077_v10, %v1085_v29 }
 0x968   :  { %v1090_v1 = vmul.f32 1.442695, %v1087_v30 }
 0x96a   :  { %2130 = vpow2.f32 %v1090_v1 }
 0x970   :  { %v2606_v31 = vpop.eup %2130 }
 0x971   :  { %v1095_v32 = vsel %vm101_vm1, %v2606_v31, 0.0 }
 0x972   :  { %1096 = vadd.xlane.f32.xlu0 %v1095_v32 }
 0x979   :  { %v1238_v33 = vpop.xlane.xlu2 %1237 }
 0x97a   :  { %v1242_v34 = vsub.f32 %v1205_v14, %v1238_v33  ;;  %v1082_v35 = vpop.xlane.xlu0 %1081 }
 0x97b   :  { %v1086_v36 = vsub.f32 %v1050_v16, %v1082_v35 }
 0x97c   :  { %v1244_v37 = vmul.f32 1.442695, %v1242_v34 }
 0x97d   :  { %v1088_v11 = vmul.f32 1.442695, %v1086_v36 }
 0x97e   :  { %2132 = vpow2.f32 %v1244_v37 }
 0x97f   :  { %2134 = vpow2.f32 %v1088_v11 }
 0x984   :  { %v2610_v38 = vpop.eup %2132 }
 0x985   :  { %v2612_v9 = vpop.eup %2134  ;;  %v1248_v39 = vsel %vm101_vm1, %v2610_v38, 0.0 }
 0x986   :  { %1249 = vadd.xlane.f32.xlu1 %v1248_v39  ;;  %v1092_v40 = vsel %vm101_vm1, %v2612_v9, 0.0 }
 0x987   :  { %v1241_v42 = vpop.xlane.xlu0 %1240  ;;  %1093 = vadd.xlane.f32.xlu2 %v1092_v40 }
 0x988   :  { %v1243_v43 = vsub.f32 %v1233_v18, %v1241_v42 }
 0x98a   :  { %v1246_v44 = vmul.f32 1.442695, %v1243_v43 }
 0x98c   :  { %2136 = vpow2.f32 %v1246_v44  ;;  %v1394_v45 = vpop.xlane.xlu1 %1393 }
 0x98d   :  { %v1398_v46 = vsub.f32 %v1361_v20, %v1394_v45 }
 0x98f   :  { %v1400_v51 = vmul.f32 1.442695, %v1398_v46  ;;  %v1397_v15 = vpop.xlane.xlu2 %1396 }
 0x990   :  { %v1399_v41 = vsub.f32 %v1389_v21, %v1397_v15 }
 0x991   :  { %2138 = vpow2.f32 %v1400_v51 }
 0x992   :  { %v2618_v48 = vpop.eup %2136  ;;  %v1402_v53 = vmul.f32 1.442695, %v1399_v41 }
 0x993   :  { %v1251_v54 = vsel %vm101_vm1, %v2618_v48, 0.0 }
 0x994   :  { %2140 = vpow2.f32 %v1402_v53  ;;  %1252 = vadd.xlane.f32.xlu2 %v1251_v54  ;;  %v1550_v55 = vpop.xlane.xlu0 %1549 }
 0x995   :  { %v1554_v5 = vsub.f32 %v1517_v22, %v1550_v55 }
 0x997   :  { %v2622_v56 = vpop.eup %2138  ;;  %v1556_v57 = vmul.f32 1.442695, %v1554_v5  ;;  %v1553_v58 = vpop.xlane.xlu1 %1552 }
 0x998   :  { %v2066_v59 = vpop.permute.xlu2 %2065  ;;  %v1555_v61 = vsub.f32 %v1545_v26, %v1553_v58  ;;  %v1404_v0 = vsel %vm101_vm1, %v2622_v56, 0.0 }
 0x999   :  { %v2068_v62 = vunpack.i.h.bf16 %v2066_v59  ;;  %v2067_v63 = vunpack.i.l.bf16 %v2066_v59  ;;  %2142 = vpow2.f32 %v1556_v57  ;;  %1405 = vadd.xlane.f32.xlu0 %v1404_v0 }
 0x99a   :  { %v2626_v2 = vpop.eup %2140  ;;  %v1558_v3 = vmul.f32 1.442695, %v1555_v61 }
 0x99b   :  { %1149 = vmatpush.msrb.mxu1 %v2067_v63  ;;  %1175 = vmatpush.msra.mxu2 %v2068_v62  ;;  %v1407_v7 = vsel %vm101_vm1, %v2626_v2, 0.0 }
 0x99c   :  { %2144 = vpow2.f32 %v1558_v3  ;;  %1408 = vadd.xlane.f32.xlu1 %v1407_v7 }
 0x99f   :  { %v2630_v52 = vpop.eup %2142 }
 0x9a0   :  { %v1560_v23 = vsel %vm101_vm1, %v2630_v52, 0.0 }
 0x9a1   :  { %1561 = vadd.xlane.f32.xlu0 %v1560_v23 }
 0x9a2   :  { %v2634_v60 = vpop.eup %2144 }
 0x9a3   :  { %v1563_v8 = vsel %vm101_vm1, %v2634_v60, 0.0 }
 0x9a4   :  { %1564 = vadd.xlane.f32.xlu1 %v1563_v8 }
 0x9ac   :  { %2080 = vrot.lane.b32.xlu2 %v2602_v28, %s2270_s29 }
 0x9b5   :  { %2070 = vrot.lane.b32.xlu0 %v2602_v28, %s2268_s27 }
 0x9bd   :  { %2075 = vrot.lane.b32.xlu1 %v2602_v28, %s2269_s28 }
 0x9e5   :  { %v1097_v10 = vpop.xlane.xlu0 %1096 }
 0x9e6   :  { %2146 = vrcp.f32 %v1097_v10  ;;  %v1124_v17 = vand.u32 2147483648, %v1097_v10  ;;  %v1122_v18 = vand.u32 2147483647, %v1097_v10  ;;  %vm1118_vm11 = vweird.f32 %v1097_v10 }
 0x9e8   :  { %v1125_v20 = vor.u32 1.1754944e-38, %v1124_v17  ;;  %vm1123_vm13 = vcmp.eq.f32.partialorder %v1122_v18, 8.507059e+37 }
 0x9ec   :  { %v2147_v12 = vpop.eup %2146 }
 0x9ed   :  { %v1114_v14 = vmul.f32 %v2147_v12, %v1097_v10  ;;  %vm1119_vm10 = vweird.f32 %v2147_v12 }
 0x9ee   :  { %vm1120_vm12 = vmor %vm1118_vm11, %vm1119_vm10 }
 0x9ef   :  { %v1115_v16 = vsub.f32 1.0, %v1114_v14 }
 0x9f1   :  { %v1116_v6 = vmul.f32 %v2147_v12, %v1115_v16 }
 0x9f3   :  { %v1117_v19 = vadd.f32 %v2147_v12, %v1116_v6 }
 0x9f5   :  { %v1121_v13 = vsel %vm1120_vm12, %v2147_v12, %v1117_v19 }
 0x9f6   :  { %v1126_v21 = vsel %vm1123_vm13, %v1125_v20, %v1121_v13 }
 0x9f7   :  { %v1127_v25 = vmul.f32 %v2606_v31, %v1126_v21 }
 0x9f9   :  { %2013 = vmatmul.msk.f32.vlgmr.msra.gmra.mxu2 %vm101_vm1, %v1127_v25  ;;  %v1250_v27 = vpop.xlane.xlu1 %1249 }
 0x9fa   :  { %v1094_v22 = vpop.xlane.xlu2 %1093  ;;  %v1265_v57 = vand.u32 2147483648, %v1250_v27  ;;  %vm1259_vm8 = vweird.f32 %v1250_v27  ;;  %v1263_v58 = vand.u32 2147483647, %v1250_v27 }
 0x9fb   :  { %2148 = vrcp.f32 %v1094_v22  ;;  %v1109_v29 = vand.u32 2147483648, %v1094_v22  ;;  %v1107_v1 = vand.u32 2147483647, %v1094_v22  ;;  %vm1103_vm2 = vweird.f32 %v1094_v22 }
 0x9fc   :  { %2150 = vrcp.f32 %v1250_v27  ;;  %v1266_v7 = vor.u32 1.1754944e-38, %v1265_v57  ;;  %vm1264_vm11 = vcmp.eq.f32.partialorder %v1263_v58, 8.507059e+37 }
 0x9fd   :  { %v1110_v34 = vor.u32 1.1754944e-38, %v1109_v29  ;;  %vm1108_vm4 = vcmp.eq.f32.partialorder %v1107_v1, 8.507059e+37 }
 0xa01   :  { %v2149_v24 = vpop.eup %2148 }
 0xa02   :  { %v1099_v26 = vmul.f32 %v2149_v24, %v1094_v22  ;;  %vm1104_vm14 = vweird.f32 %v2149_v24  ;;  %v2151_v36 = vpop.eup %2150 }
 0xa03   :  { %vm1105_vm3 = vmor %vm1103_vm2, %vm1104_vm14  ;;  %v1255_v39 = vmul.f32 %v2151_v36, %v1250_v27  ;;  %vm1260_vm5 = vweird.f32 %v2151_v36 }
 0xa04   :  { %v1100_v28 = vsub.f32 1.0, %v1099_v26  ;;  %vm1261_vm9 = vmor %vm1259_vm8, %vm1260_vm5 }
 0xa05   :  { %v1256_v43 = vsub.f32 1.0, %v1255_v39 }
 0xa06   :  { %v1101_v30 = vmul.f32 %v2149_v24, %v1100_v28 }
 0xa07   :  { %v1253_v32 = vpop.xlane.xlu2 %1252  ;;  %v1257_v51 = vmul.f32 %v2151_v36, %v1256_v43 }
 0xa08   :  { %v1102_v33 = vadd.f32 %v2149_v24, %v1101_v30  ;;  %2152 = vrcp.f32 %v1253_v32  ;;  %v1280_v23 = vand.u32 2147483648, %v1253_v32  ;;  %vm1274_vm12 = vweird.f32 %v1253_v32 }
 0xa09   :  { %v1258_v54 = vadd.f32 %v2151_v36, %v1257_v51  ;;  %v1278_v8 = vand.u32 2147483647, %v1253_v32 }
 0xa0a   :  { %v1106_v35 = vsel %vm1105_vm3, %v2149_v24, %v1102_v33  ;;  %v1281_v18 = vor.u32 1.1754944e-38, %v1280_v23 }
 0xa0b   :  { %v1111_v31 = vsel %vm1108_vm4, %v1110_v34, %v1106_v35  ;;  %v1262_v62 = vsel %vm1261_vm9, %v2151_v36, %v1258_v54  ;;  %vm1279_vm14 = vcmp.eq.f32.partialorder %v1278_v8, 8.507059e+37 }
 0xa0c   :  { %v2646_v37 = vpop.xlane.xlu0 %1405  ;;  %v1112_v11 = vmul.f32 %v2612_v9, %v1111_v31  ;;  %v1267_v10 = vsel %vm1264_vm11, %v1266_v7, %v1262_v62 }
 0xa0d   :  { %2154 = vrcp.f32 %v2646_v37  ;;  %v1268_v19 = vmul.f32 %v2610_v38, %v1267_v10  ;;  %vm1415_vm2 = vweird.f32 %v2646_v37  ;;  %v1421_v26 = vand.u32 2147483648, %v2646_v37 }
 0xa0e   :  { %2012 = vmatmul.msk.f32.vlgmr.msrb.gmra.mxu1 %vm101_vm1, %v1112_v11  ;;  %v2153_v42 = vpop.eup %2152  ;;  %v1419_v30 = vand.u32 2147483647, %v2646_v37 }
 0xa0f   :  { %v2650_v40 = vpop.xlane.xlu1 %1408  ;;  %v1270_v44 = vmul.f32 %v2153_v42, %v1253_v32  ;;  %vm1275_vm10 = vweird.f32 %v2153_v42  ;;  %v1422_v36 = vor.u32 1.1754944e-38, %v1421_v26  ;;  %v2081_v39 = vpop.permute.xlu2 %2080 }
 0xa10   :  { %2156 = vrcp.f32 %v2650_v40  ;;  %vm1276_vm13 = vmor %vm1274_vm12, %vm1275_vm10  ;;  %v1436_v27 = vand.u32 2147483648, %v2650_v40  ;;  %vm1430_vm8 = vweird.f32 %v2650_v40  ;;  %v1434_v1 = vand.u32 2147483647, %v2650_v40 }
 0xa11   :  { %v1271_v15 = vsub.f32 1.0, %v1270_v44  ;;  %vm1420_vm10 = vcmp.eq.f32.partialorder %v1419_v30, 8.507059e+37  ;;  %v2083_v57 = vunpack.i.h.bf16 %v2081_v39  ;;  %v2082_v58 = vunpack.i.l.bf16 %v2081_v39 }
 0xa12   :  { %vm1435_vm11 = vcmp.eq.f32.partialorder %v1434_v1, 8.507059e+37 }
 0xa13   :  { %v2656_v46 = vpop.eup %2154  ;;  %v1272_v55 = vmul.f32 %v2153_v42, %v1271_v15 }
 0xa14   :  { %v2654_v45 = vpop.xlane.xlu0 %1561  ;;  %v1411_v53 = vmul.f32 %v2656_v46, %v2646_v37  ;;  %vm1416_vm3 = vweird.f32 %v2656_v46  ;;  %v1437_v37 = vor.u32 1.1754944e-38, %v1436_v27 }
 0xa15   :  { %2158 = vrcp.f32 %v2654_v45  ;;  %v1273_v63 = vadd.f32 %v2153_v42, %v1272_v55  ;;  %vm2686_vm5 = vmor %vm1415_vm2, %vm1416_vm3  ;;  %vm1571_vm12 = vweird.f32 %v2654_v45 }
 0xa16   :  { %v2660_v9 = vpop.eup %2156  ;;  %v1412_v59 = vsub.f32 1.0, %v1411_v53 }
 0xa17   :  { %v2658_v41 = vpop.xlane.xlu1 %1564  ;;  %v1426_v5 = vmul.f32 %v2660_v9, %v2650_v40  ;;  %v1277_v14 = vsel %vm1276_vm13, %v2153_v42, %v1273_v63  ;;  %vm1431_vm4 = vweird.f32 %v2660_v9  ;;  %v1575_v42 = vand.u32 2147483647, %v2654_v45 }
 0xa18   :  { %2160 = vrcp.f32 %v2658_v41  ;;  %v1413_v12 = vmul.f32 %v2656_v46, %v1412_v59  ;;  %v1282_v20 = vsel %vm1279_vm14, %v1281_v18, %v1277_v14  ;;  %vm1432_vm9 = vmor %vm1430_vm8, %vm1431_vm4  ;;  %v1592_v51 = vand.u32 2147483648, %v2658_v41  ;;  %v981_v14 = vld [vmem:[#allocation5 + $0xd8] sm:$0xff] }
 0xa19   :  { %v1427_v0 = vsub.f32 1.0, %v1426_v5  ;;  %v1283_v32 = vmul.f32 %v2618_v48, %v1282_v20  ;;  %vm1586_vm3 = vweird.f32 %v2658_v41  ;;  %v1590_v54 = vand.u32 2147483647, %v2658_v41 }
 0xa1a   :  { %v1414_v13 = vadd.f32 %v2656_v46, %v1413_v12  ;;  %v1593_v62 = vor.u32 1.1754944e-38, %v1592_v51  ;;  %v984_v51 = vld [vmem:[#allocation5 + $0xf0] sm:$0xff] }
 0xa1b   :  { %v2668_v61 = vpop.eup %2158  ;;  %v1428_v16 = vmul.f32 %v2660_v9, %v1427_v0  ;;  %vm1591_vm8 = vcmp.eq.f32.partialorder %v1590_v54, 8.507059e+37 }
 0xa1c   :  { %v1567_v17 = vmul.f32 %v2668_v61, %v2654_v45  ;;  %v1418_v33 = vsel %vm2686_vm5, %v2656_v46, %v1414_v13  ;;  %vm1572_vm13 = vweird.f32 %v2668_v61  ;;  %v1577_v46 = vand.u32 2147483648, %v2654_v45 }
 0xa1d   :  { %v1429_v21 = vadd.f32 %v2660_v9, %v1428_v16  ;;  %v1423_v48 = vsel %vm1420_vm10, %v1422_v36, %v1418_v33  ;;  %vm2710_vm2 = vmor %vm1571_vm12, %vm1572_vm13  ;;  %vm1576_vm5 = vcmp.eq.f32.partialorder %v1575_v42, 8.507059e+37  ;;  %v980_v16 = vld [vmem:[#allocation5 + $0xd0] sm:$0xff] }
 0xa1e   :  { %v2670_v3 = vpop.eup %2160  ;;  %v1568_v25 = vsub.f32 1.0, %v1567_v17  ;;  %v1424_v55 = vmul.f32 %v2622_v56, %v1423_v48  ;;  %v979_v17 = vld [vmem:[#allocation5 + $0xc8] sm:$0xff] }
 0xa1f   :  { %v1582_v6 = vmul.f32 %v2670_v3, %v2658_v41  ;;  %v1433_v34 = vsel %vm1432_vm9, %v2660_v9, %v1429_v21  ;;  %vm1587_vm14 = vweird.f32 %v2670_v3  ;;  %v1578_v41 = vor.u32 1.1754944e-38, %v1577_v46  ;;  %v985_v46 = vld [vmem:[#allocation5 + $0xf8] sm:$0xff] }
 0xa20   :  { %v1569_v35 = vmul.f32 %v2668_v61, %v1568_v25  ;;  %v1438_v11 = vsel %vm1435_vm11, %v1437_v37, %v1433_v34  ;;  %vm1588_vm4 = vmor %vm1586_vm3, %vm1587_vm14 }
 0xa21   :  { %v1583_v22 = vsub.f32 1.0, %v1582_v6  ;;  %v1439_v5 = vmul.f32 %v2626_v2, %v1438_v11 }
 0xa22   :  { %v1570_v40 = vadd.f32 %v2668_v61, %v1569_v35 }
 0xa23   :  { %v1584_v31 = vmul.f32 %v2670_v3, %v1583_v22 }
 0xa24   :  { %v1574_v45 = vsel %vm2710_vm2, %v2668_v61, %v1570_v40 }
 0xa25   :  { %v1585_v43 = vadd.f32 %v2670_v3, %v1584_v31  ;;  %v1579_v56 = vsel %vm1576_vm5, %v1578_v41, %v1574_v45  ;;  %vm1954_vm5 = vcmask 58368  }
 0xa26   :  { %v1580_v63 = vmul.f32 %v2630_v52, %v1579_v56 }
 0xa27   :  { %v2071_v24 = vpop.permute.xlu0 %2070  ;;  %v1589_v59 = vsel %vm1588_vm4, %v2670_v3, %v1585_v43  ;;  %vm1905_vm4 = vcmask 1041409  }
 0xa28   :  { %v2073_v28 = vunpack.i.h.bf16 %v2071_v24  ;;  %v2072_v38 = vunpack.i.l.bf16 %v2071_v24  ;;  %v1594_v2 = vsel %vm1591_vm8, %v1593_v62, %v1589_v59 }
 0xa29   :  { %v1595_v0 = vmul.f32 %v2634_v60, %v1594_v2  ;;  %v982_v60 = vld [vmem:[#allocation5 + $0xe0] sm:$0xff] }
 0xa2a   :  { %1305 = vmatpush.msra.mxu1 %v2072_v38  ;;  %1331 = vmatpush.msrb.mxu2 %v2073_v28  ;;  %v1709_v38 = vperm.slane %v2539_v50, 1 }
 0xa2b   :  { %2018 = vmatmul.msk.f32.vlgmr.msra.gmra.mxu1 %vm101_vm1, %v1268_v19  ;;  %2019 = vmatmul.msk.f32.vlgmr.msrb.gmra.mxu2 %vm101_vm1, %v1283_v32 }
 0xa2c   :  { %1696 = vmatpush.msrb.mxu0 %v982_v60 }
 0xa2e   :  { %1697 = vmatpush.msrb.mxu0 %v981_v14 }
 0xa2f   :  { %v2076_v44 = vpop.permute.xlu1 %2075 }
 0xa30   :  { %v2078_v15 = vunpack.i.h.bf16 %v2076_v44  ;;  %v2077_v9 = vunpack.i.l.bf16 %v2076_v44  ;;  %1698 = vmatpush.msrb.mxu0 %v980_v16 }
 0xa32   :  { %1461 = vmatpush.msrb.mxu1 %v2077_v9  ;;  %1487 = vmatpush.msra.mxu2 %v2078_v15  ;;  %v983_v15 = vld [vmem:[#allocation5 + $0xe8] sm:$0xff] }
 0xa33   :  { %2024 = vmatmul.msk.f32.vlgmr.msrb.gmra.mxu1 %vm101_vm1, %v1424_v55  ;;  %2025 = vmatmul.msk.f32.vlgmr.msra.gmra.mxu2 %vm101_vm1, %v1439_v5 }
 0xa34   :  { %1617 = vmatpush.msra.mxu1 %v2082_v58  ;;  %1643 = vmatpush.msrb.mxu2 %v2083_v57 }
 0xa35   :  { %1699 = vmatpush.msrb.mxu0 %v979_v17 }
 0xa3b   :  { %2030 = vmatmul.msk.f32.vlgmr.msra.gmra.mxu1 %vm101_vm1, %v1580_v63  ;;  %2031 = vmatmul.msk.f32.vlgmr.msrb.gmra.mxu2 %vm101_vm1, %v1595_v0  ;;  %v1756_v0 = vperm.slane %v2539_v50, 2 }
 0xa7c   :  { %v1177_v3 = vpop.f32.mrf.mxu2 }
 0xa8b   :  { %v1151_v61 = vpop.f32.mrf.mxu1 }
 0xaa8   :  { %v1307_v7 = vpop.f32.mrf.mxu1 }
 0xaa9   :  { %1650 = vrot.lane.b32.xlu0 %v1307_v7, %s2258_s18 }
 0xaae   :  { %v1333_v23 = vpop.f32.mrf.mxu2 }
 0xab0   :  { %v1463_v8 = vpop.f32.mrf.mxu1 }
 0xab1   :  { %1652 = vrot.lane.b32.xlu0 %v1333_v23, %s2258_s18  ;;  %1658 = vrot.lane.b32.xlu2 %v1463_v8, %s2271_s30  ;;  %v1759_v23 = vperm.slane %v2539_v50, 3 }
 0xab6   :  { %v1489_v10 = vpop.f32.mrf.mxu2 }
 0xab8   :  { %v1619_v12 = vpop.f32.mrf.mxu1 }
 0xab9   :  { %1660 = vrot.lane.b32.xlu2 %v1489_v10, %s2271_s30  ;;  %1666 = vrot.lane.b32.xlu1 %v1619_v12, %s2272_s3 }
 0xabe   :  { %v1645_v52 = vpop.f32.mrf.mxu2 }
 0xac1   :  { %1668 = vrot.lane.b32.xlu1 %v1645_v52, %s2272_s3 }
 0xb0b   :  { %v1659_v18 = vpop.permute.xlu2 %1658 }
 0xb13   :  { %v1661_v24 = vpop.permute.xlu2 %1660 }
 0xb1b   :  { %v1651_v6 = vpop.permute.xlu0 %1650 }
 0xb1c   :  { %v1672_v19 = vsel %vm101_vm1, %v1151_v61, %v1651_v6 }
 0xb1d   :  { %v1674_v20 = vsel %vm747_vm6, %v1672_v19, %v1659_v18  ;;  %v994_v18 = vld [vmem:[#allocation5 + $0x140] sm:$0xff]  ;;  %v993_v19 = vld [vmem:[#allocation5 + $0x138] sm:$0xff] }
 0xb1e   :  { %1825 = vmatpush.msrb.mxu1 %v994_v18 }
 0xb20   :  { %1826 = vmatpush.msrb.mxu1 %v993_v19 }
 0xb23   :  { %v1653_v25 = vpop.permute.xlu0 %1652 }
 0xb24   :  { %v1673_v22 = vsel %vm101_vm1, %v1177_v3, %v1653_v25  ;;  %v989_v25 = vld [vmem:[#allocation5 + $0x118] sm:$0xff] }
 0xb25   :  { %v1675_v27 = vsel %vm747_vm6, %v1673_v22, %v1661_v24  ;;  %v988_v22 = vld [vmem:[#allocation5 + $0x110] sm:$0xff]  ;;  %v987_v24 = vld [vmem:[#allocation5 + $0x108] sm:$0xff] }
 0xb2b   :  { %v1667_v13 = vpop.permute.xlu1 %1666 }
 0xb2c   :  { %v1676_v21 = vsel %vm750_vm7, %v1674_v20, %v1667_v13  ;;  %v992_v20 = vld [vmem:[#allocation5 + $0x130] sm:$0xff]  ;;  %v991_v13 = vld [vmem:[#allocation5 + $0x128] sm:$0xff] }
 0xb2d   :  { %2032 = vmatmul.msk.f32.vlgmr.msrb.gmra.mxu0 %vm68_vm0, %v1676_v21  ;;  %1827 = vmatpush.msrb.mxu1 %v992_v20  ;;  %v990_v21 = vld [vmem:[#allocation5 + $0x120] sm:$0xff] }
 0xb2f   :  { %1828 = vmatpush.msrb.mxu1 %v991_v13 }
 0xb31   :  { %1829 = vmatpush.msrb.mxu1 %v990_v21 }
 0xb33   :  { %v1669_v26 = vpop.permute.xlu1 %1668  ;;  %1830 = vmatpush.msrb.mxu1 %v989_v25 }
 0xb34   :  { %v1677_v28 = vsel %vm750_vm7, %v1675_v27, %v1669_v26  ;;  %v1762_v26 = vperm.slane %v2539_v50, 4 }
 0xb35   :  { %2033 = vmatmul.msk.f32.gmra.mxu0 %vm68_vm0, %v1677_v28  ;;  %1831 = vmatpush.msrb.mxu1 %v988_v22 }
 0xb37   :  { %1832 = vmatpush.msrb.mxu1 %v987_v24 }
 0xbaa   :  { %v1701_v29 = vpop.f32.mrf.mxu0 }
 0xbab   :  { %v1707_v30 = vadd.f32 %v1701_v29, %v2531_v47 }
 0xbad   :  { %v1710_v1 = vadd.f32 %v1709_v38, %v1707_v30 }
 0xbaf   :  { %v1712_v32 = vsel %vm68_vm0, %v1710_v1, 0.0 }
 0xbb0   :  { %1713 = vadd.xlane.f32.xlu0 %v1712_v32 }
 0xbb2   :  { %v1704_v33 = vpop.f32.mrf.mxu0 }
 0xbb3   :  { %v1708_v34 = vadd.f32 %v1704_v33, %v2535_v49  ;;  %v986_v49 = vld [vmem:[#allocation5 + $0x100] sm:$0xff] }
 0xbb4   :  { %1781 = vmatpush.msrb.mxu3 %v986_v49 }
 0xbb5   :  { %v1711_v35 = vadd.f32 %v1709_v38, %v1708_v34 }
 0xbb6   :  { %1782 = vmatpush.msrb.mxu3 %v985_v46  ;;  %v1810_v46 = vperm.slane %v2539_v50, 5 }
 0xbb7   :  { %v1715_v31 = vsel %vm68_vm0, %v1711_v35, 0.0 }
 0xbb8   :  { %1716 = vadd.xlane.f32.xlu2 %v1715_v31  ;;  %1783 = vmatpush.msrb.mxu3 %v984_v51 }
 0xbba   :  { %1784 = vmatpush.msrb.mxu3 %v983_v15 }
 0xc23   :  { %v1714_v36 = vpop.xlane.xlu0 %1713 }
 0xc24   :  { %v1718_v37 = vmul.f32 %v1714_v36, %v2507_v4 }
 0xc26   :  { %v1720_v48 = vsub.f32 %v1710_v1, %v1718_v37 }
 0xc28   :  { %v1722_v11 = vmul.f32 %v1720_v48, %v1720_v48 }
 0xc2a   :  { %v1724_v39 = vsel %vm68_vm0, %v1722_v11, 0.0 }
 0xc2b   :  { %1725 = vadd.xlane.f32.xlu1 %v1724_v39  ;;  %v1717_v47 = vpop.xlane.xlu2 %1716 }
 0xc2c   :  { %v1719_v40 = vmul.f32 %v1717_v47, %v2507_v4 }
 0xc2e   :  { %v1721_v42 = vsub.f32 %v1711_v35, %v1719_v40 }
 0xc30   :  { %v1723_v43 = vmul.f32 %v1721_v42, %v1721_v42 }
 0xc32   :  { %v1727_v44 = vsel %vm68_vm0, %v1723_v43, 0.0 }
 0xc33   :  { %1728 = vadd.xlane.f32.xlu0 %v1727_v44 }
 0xc9e   :  { %v1726_v9 = vpop.xlane.xlu1 %1725 }
 0xc9f   :  { %v1730_v53 = vmul.f32 %v1726_v9, %v2507_v4 }
 0xca1   :  { %v1732_v54 = vadd.f32 1e-12, %v1730_v53 }
 0xca3   :  { %2162 = vrsqrt.f32 %v1732_v54  ;;  %vm1740_vm6 = vweird.f32 %v1732_v54 }
 0xca6   :  { %v1729_v55 = vpop.xlane.xlu0 %1728 }
 0xca7   :  { %v1731_v5 = vmul.f32 %v1729_v55, %v2507_v4 }
 0xca9   :  { %v2163_v57 = vpop.eup %2162  ;;  %v1733_v58 = vadd.f32 1e-12, %v1731_v5 }
 0xcaa   :  { %v1735_v45 = vmul.f32 %v2163_v57, %v1732_v54  ;;  %vm1741_vm1 = vweird.f32 %v2163_v57 }
 0xcab   :  { %2164 = vrsqrt.f32 %v1733_v58  ;;  %vm1742_vm7 = vmor %vm1740_vm6, %vm1741_vm1  ;;  %vm1750_vm10 = vweird.f32 %v1733_v58 }
 0xcac   :  { %v1736_v59 = vmul.f32 %v2163_v57, %v1735_v45 }
 0xcae   :  { %v1737_v41 = vmul.f32 0.5, %v1736_v59 }
 0xcb0   :  { %v1738_v62 = vsub.f32 1.5, %v1737_v41 }
 0xcb1   :  { %v2165_v56 = vpop.eup %2164 }
 0xcb2   :  { %v1739_v2 = vmul.f32 %v2163_v57, %v1738_v62  ;;  %v1745_v63 = vmul.f32 %v2165_v56, %v1733_v58  ;;  %vm1751_vm9 = vweird.f32 %v2165_v56 }
 0xcb3   :  { %vm1752_vm11 = vmor %vm1750_vm10, %vm1751_vm9 }
 0xcb4   :  { %v1743_v61 = vsel %vm1742_vm7, %v2163_v57, %v1739_v2  ;;  %v1746_v3 = vmul.f32 %v2165_v56, %v1745_v63 }
 0xcb5   :  { %v1754_v7 = vmul.f32 %v1743_v61, %v1720_v48 }
 0xcb6   :  { %v1747_v8 = vmul.f32 0.5, %v1746_v3 }
 0xcb7   :  { %v1757_v10 = vmul.f32 %v1756_v0, %v1754_v7 }
 0xcb8   :  { %v1748_v12 = vsub.f32 1.5, %v1747_v8  ;;  %v1894_v8 = vld [vmem:[#allocation5 + $0x160] sm:$0xff] }
 0xcb9   :  { %v1760_v52 = vadd.f32 %v1759_v23, %v1757_v10 }
 0xcba   :  { %v1749_v60 = vmul.f32 %v2165_v56, %v1748_v12  ;;  %v1893_v12 = vld [vmem:[#allocation5 + $0x158] sm:$0xff] }
 0xcbb   :  { %2034 = vmatmul.msk.f32.vlgmr.msrb.gmra.mxu3 %vm68_vm0, %v1760_v52 }
 0xcbc   :  { %v1753_v14 = vsel %vm1752_vm11, %v2165_v56, %v1749_v60 }
 0xcbd   :  { %v1755_v16 = vmul.f32 %v1753_v14, %v1721_v42 }
 0xcbf   :  { %v1758_v17 = vmul.f32 %v1756_v0, %v1755_v16 }
 0xcc1   :  { %v1761_v6 = vadd.f32 %v1759_v23, %v1758_v17  ;;  %v1895_v23 = vld [vmem:[#allocation5 + $0x168] sm:$0xff] }
 0xcc2   :  { %1921 = vmatpush.msra.mxu2 %v1895_v23 }
 0xcc3   :  { %2035 = vmatmul.msk.f32.gmra.mxu3 %vm68_vm0, %v1761_v6 }
 0xcc4   :  { %1922 = vmatpush.msra.mxu2 %v1894_v8 }
 0xcc6   :  { %1923 = vmatpush.msra.mxu2 %v1893_v12 }
 0xd3e   :  { %v1786_v27 = vpop.f32.mrf.mxu3 }
 0xd3f   :  { %v1787_v28 = vadd.f32 %v1786_v27, %v1762_v26 }
 0xd41   :  { %v1794_v38 = vmul.f32 0.044715, %v1787_v28  ;;  %v1792_v39 = vmul.f32 0.5, %v1787_v28 }
 0xd43   :  { %v1796_v29 = vmul.f32 %v1794_v38, %v1787_v28 }
 0xd45   :  { %v1798_v30 = vmul.f32 %v1796_v29, %v1787_v28 }
 0xd46   :  { %v1789_v1 = vpop.f32.mrf.mxu3 }
 0xd47   :  { %v1800_v32 = vadd.f32 %v1798_v30, %v1787_v28  ;;  %v1790_v33 = vadd.f32 %v1789_v1, %v1762_v26 }
 0xd49   :  { %v1802_v34 = vmul.f32 0.7978846, %v1800_v32  ;;  %v1795_v35 = vmul.f32 0.044715, %v1790_v33  ;;  %v1793_v43 = vmul.f32 0.5, %v1790_v33 }
 0xd4b   :  { %2166 = vtanh.f32 %v1802_v34  ;;  %v1797_v31 = vmul.f32 %v1795_v35, %v1790_v33 }
 0xd4d   :  { %v1799_v36 = vmul.f32 %v1797_v31, %v1790_v33 }
 0xd4f   :  { %v1801_v37 = vadd.f32 %v1799_v36, %v1790_v33  ;;  %v2177_v33 = vld [vmem:[#allocation5 + $0x148] sm:$0xff] }
 0xd50   :  { %v1889_v34 = vperm.slane %v2177_v33, 7 }
 0xd51   :  { %v2167_v48 = vpop.eup %2166  ;;  %v1803_v11 = vmul.f32 0.7978846, %v1801_v37 }
 0xd52   :  { %v1806_v47 = vadd.f32 1.0, %v2167_v48  ;;  %v1899_v48 = vld [vmem:[#allocation5 + $0x188] sm:$0xff] }
 0xd53   :  { %2168 = vtanh.f32 %v1803_v11  ;;  %v1898_v11 = vld [vmem:[#allocation5 + $0x180] sm:$0xff] }
 0xd54   :  { %v1808_v40 = vmul.f32 %v1806_v47, %v1792_v39  ;;  %v1897_v39 = vld [vmem:[#allocation5 + $0x178] sm:$0xff]  ;;  %v1900_v47 = vld [vmem:[#allocation5 + $0x190] sm:$0xff] }
 0xd56   :  { %2036 = vmatmul.msk.f32.vlgmr.msrb.gmra.mxu1 %vm893_vm15, %v1808_v40  ;;  %v1901_v40 = vperm.slane %v1900_v47, 0 }
 0xd59   :  { %v2169_v42 = vpop.eup %2168 }
 0xd5a   :  { %v1807_v44 = vadd.f32 1.0, %v2169_v42 }
 0xd5c   :  { %v1809_v49 = vmul.f32 %v1807_v44, %v1793_v43 }
 0xd5e   :  { %2037 = vmatmul.msk.f32.gmra.mxu1 %vm893_vm15, %v1809_v49  ;;  %v1930_v49 = vperm.slane %v1900_v47, 1 }
 0xdd3   :  { %v1834_v51 = vpop.f32.mrf.mxu1 }
 0xdd4   :  { %v1835_v15 = vadd.f32 %v1834_v51, %v1810_v46 }
 0xdd6   :  { %v1840_v9 = vadd.f32 %v1835_v15, %v1760_v52  ;;  %v1892_v52 = vld [vmem:[#allocation5 + $0x150] sm:$0xff] }
 0xdd7   :  { %1924 = vmatpush.msra.mxu2 %v1892_v52 }
 0xdd8   :  { %v1842_v53 = vsel %vm68_vm0, %v1840_v9, 0.0 }
 0xdd9   :  { %1843 = vadd.xlane.f32.xlu1 %v1842_v53  ;;  %1946 = vmatpush.msrb.mxu2 %v1899_v48 }
 0xddb   :  { %v1837_v54 = vpop.f32.mrf.mxu1  ;;  %1947 = vmatpush.msrb.mxu2 %v1898_v11 }
 0xddc   :  { %v1838_v55 = vadd.f32 %v1837_v54, %v1810_v46 }
 0xddd   :  { %1948 = vmatpush.msrb.mxu2 %v1897_v39 }
 0xdde   :  { %v1841_v5 = vadd.f32 %v1838_v55, %v1761_v6 }
 0xde0   :  { %v1845_v57 = vsel %vm68_vm0, %v1841_v5, 0.0 }
 0xde1   :  { %1846 = vadd.xlane.f32.xlu2 %v1845_v57 }
 0xe4c   :  { %v1844_v58 = vpop.xlane.xlu1 %1843 }
 0xe4d   :  { %v1848_v45 = vmul.f32 %v1844_v58, %v2507_v4 }
 0xe4f   :  { %v1850_v59 = vsub.f32 %v1840_v9, %v1848_v45 }
 0xe51   :  { %v1852_v41 = vmul.f32 %v1850_v59, %v1850_v59 }
 0xe53   :  { %v1854_v62 = vsel %vm68_vm0, %v1852_v41, 0.0 }
 0xe54   :  { %v1847_v56 = vpop.xlane.xlu2 %1846  ;;  %1855 = vadd.xlane.f32.xlu2 %v1854_v62 }
 0xe55   :  { %v1849_v2 = vmul.f32 %v1847_v56, %v2507_v4 }
 0xe57   :  { %v1851_v63 = vsub.f32 %v1841_v5, %v1849_v2 }
 0xe59   :  { %v1853_v0 = vmul.f32 %v1851_v63, %v1851_v63 }
 0xe5b   :  { %v1857_v61 = vsel %vm68_vm0, %v1853_v0, 0.0 }
 0xe5c   :  { %1858 = vadd.xlane.f32.xlu0 %v1857_v61 }
 0xec7   :  { %v1856_v3 = vpop.xlane.xlu2 %1855 }
 0xec8   :  { %v1860_v7 = vmul.f32 %v1856_v3, %v2507_v4 }
 0xeca   :  { %v1862_v10 = vadd.f32 1e-12, %v1860_v7 }
 0xecc   :  { %2170 = vrsqrt.f32 %v1862_v10  ;;  %vm1870_vm12 = vweird.f32 %v1862_v10 }
 0xecf   :  { %v1859_v60 = vpop.xlane.xlu0 %1858 }
 0xed0   :  { %v1861_v14 = vmul.f32 %v1859_v60, %v2507_v4  ;;  %v1886_v4 = vperm.slane %v2539_v50, 6  ;;  %v1896_v50 = vld [vmem:[#allocation5 + $0x170] sm:$0xff] }
 0xed1   :  { %1949 = vmatpush.msrb.mxu2 %v1896_v50 }
 0xed2   :  { %v2171_v16 = vpop.eup %2170  ;;  %v1863_v17 = vadd.f32 1e-12, %v1861_v14 }
 0xed3   :  { %v1865_v6 = vmul.f32 %v2171_v16, %v1862_v10  ;;  %vm1871_vm15 = vweird.f32 %v2171_v16 }
 0xed4   :  { %2172 = vrsqrt.f32 %v1863_v17  ;;  %vm1872_vm13 = vmor %vm1870_vm12, %vm1871_vm15  ;;  %vm1880_vm2 = vweird.f32 %v1863_v17 }
 0xed5   :  { %v1866_v18 = vmul.f32 %v2171_v16, %v1865_v6 }
 0xed7   :  { %v1867_v19 = vmul.f32 0.5, %v1866_v18 }
 0xed9   :  { %v1868_v20 = vsub.f32 1.5, %v1867_v19 }
 0xeda   :  { %v2173_v13 = vpop.eup %2172 }
 0xedb   :  { %v1875_v21 = vmul.f32 %v2173_v13, %v1863_v17  ;;  %v1869_v25 = vmul.f32 %v2171_v16, %v1868_v20  ;;  %vm1881_vm14 = vweird.f32 %v2173_v13 }
 0xedc   :  { %vm1882_vm3 = vmor %vm1880_vm2, %vm1881_vm14 }
 0xedd   :  { %v1876_v22 = vmul.f32 %v2173_v13, %v1875_v21  ;;  %v1873_v26 = vsel %vm1872_vm13, %v2171_v16, %v1869_v25 }
 0xede   :  { %v1884_v38 = vmul.f32 %v1873_v26, %v1850_v59 }
 0xedf   :  { %v1877_v24 = vmul.f32 0.5, %v1876_v22 }
 0xee0   :  { %v1887_v1 = vmul.f32 %v1886_v4, %v1884_v38 }
 0xee1   :  { %v1878_v27 = vsub.f32 1.5, %v1877_v24 }
 0xee2   :  { %v1890_v31 = vadd.f32 %v1889_v34, %v1887_v1 }
 0xee3   :  { %v1879_v28 = vmul.f32 %v2173_v13, %v1878_v27 }
 0xee5   :  { %v1883_v29 = vsel %vm1882_vm3, %v2173_v13, %v1879_v28 }
 0xee6   :  { %v1885_v30 = vmul.f32 %v1883_v29, %v1851_v63 }
 0xee8   :  { %v1888_v32 = vmul.f32 %v1886_v4, %v1885_v30 }
 0xeea   :  { %v1891_v35 = vadd.f32 %v1889_v34, %v1888_v32 }
 0xeec   :  { %v1904_v36 = vrot.slane %v1891_v35, 7 }
 0xeee   :  { %v1906_v37 = vsel %vm1905_vm4, %v1904_v36, %v1890_v31 }
 0xeef   :  { %2038 = vmatmul.msk.f32.vlgmr.msra.gmra.mxu2 %vm68_vm0, %v1906_v37 }
 0xf72   :  { %v1926_v42 = vpop.f32.mrf.mxu2 }
 0xf73   :  { %v1927_v43 = vadd.f32 %v1926_v42, %v1901_v40 }
 0xf75   :  { %2174 = vtanh.f32 %v1927_v43 }
 0xf7b   :  { %v2175_v44 = vpop.eup %2174 }
 0xf7c   :  { %2039 = vmatmul.msk.f32.vlgmr.msrb.gmra.mxu2 %vm68_vm0, %v2175_v44 }
 0xfff   :  { %v1951_v46 = vpop.f32.mrf.mxu2 }
0x1000   :  { %v1952_v51 = vadd.f32 %v1951_v46, %v1930_v49 }
0x1002   :  { %1955 = vst.msk [vmem:[#allocation7] sm:$0x3] %vm1954_vm5, %v1952_v51 }
0x1003   :  { %1966 = dma.vmem_to_hbm [thread:$0]  %s1962_s5, 32, %s1964_s8, [#allocation4]  }
0x1004   :  { %2254 = dma.done.wait [#allocation4], 32  }
0x1005   :  { %2255 = vsyncadd [#allocation4], 4294967264 }
0x1006   :  { %1971 = vsyncpa [#allocation3], 1 }
0x1007   :  { %1972 = vsyncpa [#allocation6], 1 }
0x1008   :  { %1973 = vsyncpa [#allocation4], 1 }

</bundles_post_ra>
